<compile_context>
chip_gen: v6e
topology: v6e:2x2x1
jax: 0.10.0
libtpu: 0.0.40
codegen_flags: <defaults>
</compile_context>

<pallas_src>
import math

import jax
import jax.numpy as jnp
from jax import lax
from jax.experimental import pallas as pl
from jax.experimental.pallas import tpu as pltpu  # noqa: F401  (TPU backend)

D_MODEL = 32
N_HEAD = 4
HEAD_DIM = D_MODEL // N_HEAD
DIM_FF = 64
NUM_LAYERS = 2
EPS = 1e-5  # nn.LayerNorm default

_PACK_ORDER = ("wqk", "bqk", "wv", "bv", "wo", "bo",
               "w1", "b1", "w2", "b2", "n1w", "n1b", "n2w", "n2b")


def _layer_norm(x, w, b):
    # x: (BS, D); w, b: (1, D). Biased variance, like torch.nn.LayerNorm.
    mu = jnp.mean(x, axis=-1, keepdims=True)
    var = jnp.mean((x - mu) ** 2, axis=-1, keepdims=True)
    return (x - mu) * lax.rsqrt(var + EPS) * w + b


def _bf16(a):
    return a.astype(jnp.bfloat16)


def encoder_kernel(x_ref, p_ref, hm_ref, bias_ref,
                   wqk_ref, bqk_ref, wv_ref, bv_ref, wo_ref, bo_ref,
                   w1_ref, b1_ref, w2_ref, b2_ref,
                   n1w_ref, n1b_ref, n2w_ref, n2b_ref,
                   out_ref):
    """Full NUM_LAYERS-deep post-norm encoder for the whole (folded) batch."""
    D = x_ref.shape[1]
    H = N_HEAD
    hd = D // H
    scale = 1.0 / math.sqrt(hd)
    nt = (((1,), (1,)), ((), ()))          # contract last dims: A @ B.T on MXU

    x = x_ref[...]                          # (BS, D) f32, resident on-chip
    p = p_ref[...]                          # (BS, D) positional embedding
    head_mask = hm_ref[...]                 # (H*BS, D) f32 constant
    head_mask_bf = _bf16(head_mask)         # reused every layer (hoisted)
    score_bias = bias_ref[...]              # (BS, H*BS): 0 same-batch / -1e30

    # Static unroll is fine at NUM_LAYERS=2; switch to lax.fori_loop with
    # dynamic w_ref[l] indexing if the layer count grows.
    for l in range(NUM_LAYERS):
        # ---- fused q|k projection on (src + pos); v projection on src ------
        qk = jnp.dot(_bf16(x + p), wqk_ref[l],
                     preferred_element_type=jnp.float32) + bqk_ref[l]
        q = qk[:, :D]                       # static lane slices (<=128 lanes)
        k = qk[:, D:]
        v = jnp.dot(_bf16(x), wv_ref[l],
                    preferred_element_type=jnp.float32) + bv_ref[l]

        # ---- batch+head block-diagonal multi-head attention -----------------
        # Stacked rows r = h*(B*S) + b*S + j ; feature d belongs to head d//hd.
        k_bd = _bf16(jnp.tile(k, (H, 1)) * head_mask)          # (H*BS, D)
        v_bd = _bf16(jnp.tile(v, (H, 1)) * head_mask)          # (H*BS, D)

        scores = lax.dot_general(_bf16(q), k_bd, nt,
                                 preferred_element_type=jnp.float32)
        scores = scores * scale + score_bias                   # (BS, H*BS)
        m = jnp.max(scores, axis=-1, keepdims=True)
        e = jnp.exp(scores - m)             # masked cols -> exp(-1e30) == 0
        e_bf = _bf16(e)

        # Unnormalized context and per-(batch, head) denominator (broadcast to
        # that head's features by the mask matmul); normalize on the output.
        ctx_un = jnp.dot(e_bf, v_bd, preferred_element_type=jnp.float32)
        denom = jnp.dot(e_bf, head_mask_bf, preferred_element_type=jnp.float32)
        ctx = ctx_un * pl.reciprocal(jnp.maximum(denom, 1e-20), approx=False)

        attn = jnp.dot(_bf16(ctx), wo_ref[l],
                       preferred_element_type=jnp.float32) + bo_ref[l]

        # ---- residual (on pre-pos src) + norm1 ------------------------------
        x = _layer_norm(x + attn, n1w_ref[l], n1b_ref[l])

        # ---- feed-forward: linear2(relu(linear1(x))) ------------------------
        h1 = jnp.dot(_bf16(x), w1_ref[l],
                     preferred_element_type=jnp.float32) + b1_ref[l]
        h1 = jnp.maximum(h1, 0.0)
        ff = jnp.dot(_bf16(h1), w2_ref[l],
                     preferred_element_type=jnp.float32) + b2_ref[l]

        # ---- residual + norm2 -----------------------------------------------
        x = _layer_norm(x + ff, n2w_ref[l], n2b_ref[l])

    out_ref[...] = x


def _make_masks(B, S, D):
    """Constant block-diagonal masks (built once in the wrapper, not per call)."""
    H, hd = N_HEAD, D // N_HEAD
    BS = B * S
    HBS = H * BS
    # head_mask[r, d] = 1 iff stacked row r (= h*B*S + b*S + j) and feature d
    # belong to the same head h = d // hd.
    r_head = jnp.arange(HBS)[:, None] // BS
    d_head = jnp.arange(D)[None, :] // hd
    head_mask = (r_head == d_head).astype(jnp.float32)                  # (HBS, D)
    # score_bias[i, r] = 0 if query row i (batch i//S) and stacked key row r
    # (batch (r % BS)//S) belong to the same batch element, else -1e30.
    q_batch = jnp.arange(BS)[:, None] // S
    k_batch = (jnp.arange(HBS)[None, :] % BS) // S
    score_bias = jnp.where(q_batch == k_batch, 0.0, -1e30).astype(jnp.float32)
    return head_mask, score_bias


def transformer_encoder(src, pos, packed):
    """src, pos: (S, B, D) float32 (PyTorch convention). Returns (S, B, D)."""
    S, B, D = src.shape
    BS = B * S
    # Layout plumbing in XLA (free at this size): (S, B, D) -> (B*S, D) so the
    # kernel sees one sublane/lane-dense slab and every matmul has M = B*S rows.
    x2d = jnp.transpose(src, (1, 0, 2)).reshape(BS, D)
    p2d = jnp.transpose(pos, (1, 0, 2)).reshape(BS, D)
    head_mask, score_bias = _make_masks(B, S, D)

    weights = [packed[name] for name in _PACK_ORDER]
    out2d = pl.pallas_call(
        encoder_kernel,
        out_shape=jax.ShapeDtypeStruct((BS, D), jnp.float32),
    )(x2d, p2d, head_mask, score_bias, *weights)

    return jnp.transpose(out2d.reshape(B, S, D), (1, 0, 2))


def pack_params(layer_params):
    """One-time layout plumbing: fuse q|k, transpose, cast MXU weights to bf16,
    stack layers with a leading (NUM_LAYERS, ...) axis."""
    D = D_MODEL
    bf = jnp.bfloat16

    def stack(fn, dtype=jnp.float32):
        return jnp.stack([fn(p) for p in layer_params], axis=0).astype(dtype)

    return {
        "wqk": stack(lambda p: p["in_proj_w"][0:2 * D, :].T, bf),     # (L, D, 2D)
        "bqk": stack(lambda p: p["in_proj_b"][:, 0:2 * D]),           # (L, 1, 2D)
        "wv": stack(lambda p: p["in_proj_w"][2 * D:3 * D, :].T, bf),  # (L, D, D)
        "bv": stack(lambda p: p["in_proj_b"][:, 2 * D:3 * D]),        # (L, 1, D)
        "wo": stack(lambda p: p["out_proj_w"].T, bf),                 # (L, D, D)
        "bo": stack(lambda p: p["out_proj_b"]),                       # (L, 1, D)
        "w1": stack(lambda p: p["lin1_w"].T, bf),                     # (L, D, FF)
        "b1": stack(lambda p: p["lin1_b"]),                           # (L, 1, FF)
        "w2": stack(lambda p: p["lin2_w"].T, bf),                     # (L, FF, D)
        "b2": stack(lambda p: p["lin2_b"]),                           # (L, 1, D)
        "n1w": stack(lambda p: p["norm1_w"]),
        "n1b": stack(lambda p: p["norm1_b"]),
        "n2w": stack(lambda p: p["norm2_w"]),
        "n2b": stack(lambda p: p["norm2_b"]),
    }


def init_layer_params(key):
    """Weights in the PyTorch (torch.nn) storage convention."""
    ks = jax.random.split(key, 6)
    D, FF = D_MODEL, DIM_FF
    return {
        "in_proj_w": 0.05 * jax.random.normal(ks[0], (3 * D, D), jnp.float32),
        "in_proj_b": 0.01 * jax.random.normal(ks[1], (1, 3 * D), jnp.float32),
        "out_proj_w": 0.05 * jax.random.normal(ks[2], (D, D), jnp.float32),
        "out_proj_b": jnp.zeros((1, D), jnp.float32),
        "lin1_w": 0.05 * jax.random.normal(ks[3], (FF, D), jnp.float32),
        "lin1_b": jnp.zeros((1, FF), jnp.float32),
        "lin2_w": 0.05 * jax.random.normal(ks[4], (D, FF), jnp.float32),
        "lin2_b": jnp.zeros((1, D), jnp.float32),
        "norm1_w": jnp.ones((1, D), jnp.float32),
        "norm1_b": jnp.zeros((1, D), jnp.float32),
        "norm2_w": jnp.ones((1, D), jnp.float32),
        "norm2_b": jnp.zeros((1, D), jnp.float32),
    }


if __name__ == "__main__":
    key = jax.random.PRNGKey(0)
    k_src, k_pos, k_par = jax.random.split(key, 3)

    S, B, D = 8, 2, D_MODEL
    src = jax.random.normal(k_src, (S, B, D), jnp.float32)
    pos = jax.random.normal(k_pos, (S, B, D), jnp.float32)

    layer_keys = jax.random.split(k_par, NUM_LAYERS)
    layer_params = [init_layer_params(k) for k in layer_keys]
    packed = pack_params(layer_params)          # one-time layout plumbing

    encoder = jax.jit(transformer_encoder)
    out = jax.block_until_ready(encoder(src, pos, packed))

    assert out.shape == (S, B, D)
    assert bool(jnp.all(jnp.isfinite(out)))
    print("KERNEL_OK")
</pallas_src>

<mosaic_0001>
module attributes {stable_mosaic.version = 11 : i64} {
  func.func @encoder_kernel(%arg0: memref<16x32xf32, #tpu.memory_space<vmem>>, %arg1: memref<16x32xf32, #tpu.memory_space<vmem>>, %arg2: memref<64x32xf32, #tpu.memory_space<vmem>>, %arg3: memref<16x64xf32, #tpu.memory_space<vmem>>, %arg4: memref<2x32x64xbf16, #tpu.memory_space<vmem>>, %arg5: memref<2x1x64xf32, #tpu.memory_space<vmem>>, %arg6: memref<2x32x32xbf16, #tpu.memory_space<vmem>>, %arg7: memref<2x1x32xf32, #tpu.memory_space<vmem>>, %arg8: memref<2x32x32xbf16, #tpu.memory_space<vmem>>, %arg9: memref<2x1x32xf32, #tpu.memory_space<vmem>>, %arg10: memref<2x32x64xbf16, #tpu.memory_space<vmem>>, %arg11: memref<2x1x64xf32, #tpu.memory_space<vmem>>, %arg12: memref<2x64x32xbf16, #tpu.memory_space<vmem>>, %arg13: memref<2x1x32xf32, #tpu.memory_space<vmem>>, %arg14: memref<2x1x32xf32, #tpu.memory_space<vmem>>, %arg15: memref<2x1x32xf32, #tpu.memory_space<vmem>>, %arg16: memref<2x1x32xf32, #tpu.memory_space<vmem>>, %arg17: memref<2x1x32xf32, #tpu.memory_space<vmem>>, %arg18: memref<16x32xf32, #tpu.memory_space<vmem>>) attributes {dimension_semantics = [], scalar_prefetch = 0 : i64, scratch_operands = 0 : i64, tpu.core_type = #tpu.core_type<tc>} {
    %c0 = arith.constant 0 : index
    %c0_0 = arith.constant 0 : index
    %0 = vector.load %arg0[%c0, %c0_0] : memref<16x32xf32, #tpu.memory_space<vmem>>, vector<16x32xf32>
    %c0_1 = arith.constant 0 : index
    %c0_2 = arith.constant 0 : index
    %1 = vector.load %arg1[%c0_1, %c0_2] : memref<16x32xf32, #tpu.memory_space<vmem>>, vector<16x32xf32>
    %c0_3 = arith.constant 0 : index
    %c0_4 = arith.constant 0 : index
    %2 = vector.load %arg2[%c0_3, %c0_4] : memref<64x32xf32, #tpu.memory_space<vmem>>, vector<64x32xf32>
    %3 = arith.truncf %2 : vector<64x32xf32> to vector<64x32xbf16>
    %c0_5 = arith.constant 0 : index
    %c0_6 = arith.constant 0 : index
    %4 = vector.load %arg3[%c0_5, %c0_6] : memref<16x64xf32, #tpu.memory_space<vmem>>, vector<16x64xf32>
    %5 = arith.addf %0, %1 : vector<16x32xf32>
    %6 = arith.truncf %5 : vector<16x32xf32> to vector<16x32xbf16>
    %c0_7 = arith.constant 0 : index
    %c0_8 = arith.constant 0 : index
    %c0_9 = arith.constant 0 : index
    %7 = vector.load %arg4[%c0_7, %c0_8, %c0_9] : memref<2x32x64xbf16, #tpu.memory_space<vmem>>, vector<1x32x64xbf16>
    %8 = vector.shape_cast %7 : vector<1x32x64xbf16> to vector<32x64xbf16>
    %cst = arith.constant dense<0.000000e+00> : vector<16x64xf32>
    %9 = tpu.matmul %6, %8, %cst {dimension_numbers = #tpu.dot_dimension_numbers<[1], [0], [0], [1], [0, 0, 1, 1], [], []>} : vector<16x32xbf16>, vector<32x64xbf16>, vector<16x64xf32> -> vector<16x64xf32>
    %c0_10 = arith.constant 0 : index
    %c0_11 = arith.constant 0 : index
    %c0_12 = arith.constant 0 : index
    %10 = vector.load %arg5[%c0_10, %c0_11, %c0_12] : memref<2x1x64xf32, #tpu.memory_space<vmem>>, vector<1x1x64xf32>
    %11 = vector.shape_cast %10 : vector<1x1x64xf32> to vector<1x64xf32>
    %12 = vector.broadcast %11 : vector<1x64xf32> to vector<16x64xf32>
    %13 = arith.addf %9, %12 : vector<16x64xf32>
    %14 = vector.extract_strided_slice %13 {offsets = [0, 0], sizes = [16, 32], strides = [1, 1]} : vector<16x64xf32> to vector<16x32xf32>
    %15 = vector.extract_strided_slice %13 {offsets = [0, 32], sizes = [16, 32], strides = [1, 1]} : vector<16x64xf32> to vector<16x32xf32>
    %16 = arith.truncf %0 : vector<16x32xf32> to vector<16x32xbf16>
    %c0_13 = arith.constant 0 : index
    %c0_14 = arith.constant 0 : index
    %c0_15 = arith.constant 0 : index
    %17 = vector.load %arg6[%c0_13, %c0_14, %c0_15] : memref<2x32x32xbf16, #tpu.memory_space<vmem>>, vector<1x32x32xbf16>
    %18 = vector.shape_cast %17 : vector<1x32x32xbf16> to vector<32x32xbf16>
    %cst_16 = arith.constant dense<0.000000e+00> : vector<16x32xf32>
    %19 = tpu.matmul %16, %18, %cst_16 {dimension_numbers = #tpu.dot_dimension_numbers<[1], [0], [0], [1], [0, 0, 1, 1], [], []>} : vector<16x32xbf16>, vector<32x32xbf16>, vector<16x32xf32> -> vector<16x32xf32>
    %c0_17 = arith.constant 0 : index
    %c0_18 = arith.constant 0 : index
    %c0_19 = arith.constant 0 : index
    %20 = vector.load %arg7[%c0_17, %c0_18, %c0_19] : memref<2x1x32xf32, #tpu.memory_space<vmem>>, vector<1x1x32xf32>
    %21 = vector.shape_cast %20 : vector<1x1x32xf32> to vector<1x32xf32>
    %22 = vector.broadcast %21 : vector<1x32xf32> to vector<16x32xf32>
    %23 = arith.addf %19, %22 : vector<16x32xf32>
    %24 = tpu.concatenate %15, %15, %15, %15 in 0 : vector<16x32xf32>, vector<16x32xf32>, vector<16x32xf32>, vector<16x32xf32> -> vector<64x32xf32>
    %25 = arith.mulf %24, %2 : vector<64x32xf32>
    %26 = arith.truncf %25 : vector<64x32xf32> to vector<64x32xbf16>
    %27 = tpu.concatenate %23, %23, %23, %23 in 0 : vector<16x32xf32>, vector<16x32xf32>, vector<16x32xf32>, vector<16x32xf32> -> vector<64x32xf32>
    %28 = arith.mulf %27, %2 : vector<64x32xf32>
    %29 = arith.truncf %28 : vector<64x32xf32> to vector<64x32xbf16>
    %30 = arith.truncf %14 : vector<16x32xf32> to vector<16x32xbf16>
    %cst_20 = arith.constant dense<0.000000e+00> : vector<16x64xf32>
    %31 = tpu.matmul %30, %26, %cst_20 {dimension_numbers = #tpu.dot_dimension_numbers<[1], [1], [0], [0], [0, 0, 1, 0], [], []>} : vector<16x32xbf16>, vector<64x32xbf16>, vector<16x64xf32> -> vector<16x64xf32>
    %cst_21 = arith.constant 0.353553385 : f32
    %32 = vector.broadcast %cst_21 : f32 to vector<16x64xf32>
    %33 = arith.mulf %31, %32 : vector<16x64xf32>
    %34 = arith.addf %33, %4 : vector<16x64xf32>
    %cst_22 = arith.constant dense<0xFF800000> : vector<16xf32>
    %35 = vector.multi_reduction <maximumf>, %34, %cst_22 [1] : vector<16x64xf32> to vector<16xf32>
    %36 = vector.shape_cast %35 : vector<16xf32> to vector<16x1xf32>
    %37 = vector.broadcast %36 : vector<16x1xf32> to vector<16x64xf32>
    %38 = arith.subf %34, %37 : vector<16x64xf32>
    %39 = math.exp %38 : vector<16x64xf32>
    %40 = arith.truncf %39 : vector<16x64xf32> to vector<16x64xbf16>
    %cst_23 = arith.constant dense<0.000000e+00> : vector<16x32xf32>
    %41 = tpu.matmul %40, %29, %cst_23 {dimension_numbers = #tpu.dot_dimension_numbers<[1], [0], [0], [1], [0, 0, 1, 1], [], []>} : vector<16x64xbf16>, vector<64x32xbf16>, vector<16x32xf32> -> vector<16x32xf32>
    %cst_24 = arith.constant dense<0.000000e+00> : vector<16x32xf32>
    %42 = tpu.matmul %40, %3, %cst_24 {dimension_numbers = #tpu.dot_dimension_numbers<[1], [0], [0], [1], [0, 0, 1, 1], [], []>} : vector<16x64xbf16>, vector<64x32xbf16>, vector<16x32xf32> -> vector<16x32xf32>
    %cst_25 = arith.constant 9.99999968E-21 : f32
    %43 = vector.broadcast %cst_25 : f32 to vector<16x32xf32>
    %44 = arith.maximumf %42, %43 : vector<16x32xf32>
    %45 = tpu.reciprocal %44 : vector<16x32xf32> -> vector<16x32xf32>
    %46 = arith.mulf %41, %45 : vector<16x32xf32>
    %47 = arith.truncf %46 : vector<16x32xf32> to vector<16x32xbf16>
    %c0_26 = arith.constant 0 : index
    %c0_27 = arith.constant 0 : index
    %c0_28 = arith.constant 0 : index
    %48 = vector.load %arg8[%c0_26, %c0_27, %c0_28] : memref<2x32x32xbf16, #tpu.memory_space<vmem>>, vector<1x32x32xbf16>
    %49 = vector.shape_cast %48 : vector<1x32x32xbf16> to vector<32x32xbf16>
    %cst_29 = arith.constant dense<0.000000e+00> : vector<16x32xf32>
    %50 = tpu.matmul %47, %49, %cst_29 {dimension_numbers = #tpu.dot_dimension_numbers<[1], [0], [0], [1], [0, 0, 1, 1], [], []>} : vector<16x32xbf16>, vector<32x32xbf16>, vector<16x32xf32> -> vector<16x32xf32>
    %c0_30 = arith.constant 0 : index
    %c0_31 = arith.constant 0 : index
    %c0_32 = arith.constant 0 : index
    %51 = vector.load %arg9[%c0_30, %c0_31, %c0_32] : memref<2x1x32xf32, #tpu.memory_space<vmem>>, vector<1x1x32xf32>
    %52 = vector.shape_cast %51 : vector<1x1x32xf32> to vector<1x32xf32>
    %53 = vector.broadcast %52 : vector<1x32xf32> to vector<16x32xf32>
    %54 = arith.addf %50, %53 : vector<16x32xf32>
    %55 = arith.addf %0, %54 : vector<16x32xf32>
    %c0_33 = arith.constant 0 : index
    %c0_34 = arith.constant 0 : index
    %c0_35 = arith.constant 0 : index
    %56 = vector.load %arg14[%c0_33, %c0_34, %c0_35] : memref<2x1x32xf32, #tpu.memory_space<vmem>>, vector<1x1x32xf32>
    %57 = vector.shape_cast %56 : vector<1x1x32xf32> to vector<1x32xf32>
    %c0_36 = arith.constant 0 : index
    %c0_37 = arith.constant 0 : index
    %c0_38 = arith.constant 0 : index
    %58 = vector.load %arg15[%c0_36, %c0_37, %c0_38] : memref<2x1x32xf32, #tpu.memory_space<vmem>>, vector<1x1x32xf32>
    %59 = vector.shape_cast %58 : vector<1x1x32xf32> to vector<1x32xf32>
    %cst_39 = arith.constant dense<0.000000e+00> : vector<16xf32>
    %60 = vector.multi_reduction <add>, %55, %cst_39 [1] : vector<16x32xf32> to vector<16xf32>
    %61 = vector.shape_cast %60 : vector<16xf32> to vector<16x1xf32>
    %cst_40 = arith.constant 3.200000e+01 : f32
    %62 = vector.broadcast %cst_40 : f32 to vector<16x1xf32>
    %63 = arith.divf %61, %62 : vector<16x1xf32>
    %64 = vector.broadcast %63 : vector<16x1xf32> to vector<16x32xf32>
    %65 = arith.subf %55, %64 : vector<16x32xf32>
    %66 = arith.mulf %65, %65 : vector<16x32xf32>
    %cst_41 = arith.constant dense<0.000000e+00> : vector<16xf32>
    %67 = vector.multi_reduction <add>, %66, %cst_41 [1] : vector<16x32xf32> to vector<16xf32>
    %68 = vector.shape_cast %67 : vector<16xf32> to vector<16x1xf32>
    %cst_42 = arith.constant 3.200000e+01 : f32
    %69 = vector.broadcast %cst_42 : f32 to vector<16x1xf32>
    %70 = arith.divf %68, %69 : vector<16x1xf32>
    %71 = vector.broadcast %63 : vector<16x1xf32> to vector<16x32xf32>
    %72 = arith.subf %55, %71 : vector<16x32xf32>
    %cst_43 = arith.constant 9.99999974E-6 : f32
    %73 = vector.broadcast %cst_43 : f32 to vector<16x1xf32>
    %74 = arith.addf %70, %73 : vector<16x1xf32>
    %75 = math.rsqrt %74 : vector<16x1xf32>
    %76 = vector.broadcast %75 : vector<16x1xf32> to vector<16x32xf32>
    %77 = arith.mulf %72, %76 : vector<16x32xf32>
    %78 = vector.broadcast %57 : vector<1x32xf32> to vector<16x32xf32>
    %79 = arith.mulf %77, %78 : vector<16x32xf32>
    %80 = vector.broadcast %59 : vector<1x32xf32> to vector<16x32xf32>
    %81 = arith.addf %79, %80 : vector<16x32xf32>
    %82 = arith.truncf %81 : vector<16x32xf32> to vector<16x32xbf16>
    %c0_44 = arith.constant 0 : index
    %c0_45 = arith.constant 0 : index
    %c0_46 = arith.constant 0 : index
    %83 = vector.load %arg10[%c0_44, %c0_45, %c0_46] : memref<2x32x64xbf16, #tpu.memory_space<vmem>>, vector<1x32x64xbf16>
    %84 = vector.shape_cast %83 : vector<1x32x64xbf16> to vector<32x64xbf16>
    %cst_47 = arith.constant dense<0.000000e+00> : vector<16x64xf32>
    %85 = tpu.matmul %82, %84, %cst_47 {dimension_numbers = #tpu.dot_dimension_numbers<[1], [0], [0], [1], [0, 0, 1, 1], [], []>} : vector<16x32xbf16>, vector<32x64xbf16>, vector<16x64xf32> -> vector<16x64xf32>
    %c0_48 = arith.constant 0 : index
    %c0_49 = arith.constant 0 : index
    %c0_50 = arith.constant 0 : index
    %86 = vector.load %arg11[%c0_48, %c0_49, %c0_50] : memref<2x1x64xf32, #tpu.memory_space<vmem>>, vector<1x1x64xf32>
    %87 = vector.shape_cast %86 : vector<1x1x64xf32> to vector<1x64xf32>
    %88 = vector.broadcast %87 : vector<1x64xf32> to vector<16x64xf32>
    %89 = arith.addf %85, %88 : vector<16x64xf32>
    %cst_51 = arith.constant 0.000000e+00 : f32
    %90 = vector.broadcast %cst_51 : f32 to vector<16x64xf32>
    %91 = arith.maximumf %89, %90 : vector<16x64xf32>
    %92 = arith.truncf %91 : vector<16x64xf32> to vector<16x64xbf16>
    %c0_52 = arith.constant 0 : index
    %c0_53 = arith.constant 0 : index
    %c0_54 = arith.constant 0 : index
    %93 = vector.load %arg12[%c0_52, %c0_53, %c0_54] : memref<2x64x32xbf16, #tpu.memory_space<vmem>>, vector<1x64x32xbf16>
    %94 = vector.shape_cast %93 : vector<1x64x32xbf16> to vector<64x32xbf16>
    %cst_55 = arith.constant dense<0.000000e+00> : vector<16x32xf32>
    %95 = tpu.matmul %92, %94, %cst_55 {dimension_numbers = #tpu.dot_dimension_numbers<[1], [0], [0], [1], [0, 0, 1, 1], [], []>} : vector<16x64xbf16>, vector<64x32xbf16>, vector<16x32xf32> -> vector<16x32xf32>
    %c0_56 = arith.constant 0 : index
    %c0_57 = arith.constant 0 : index
    %c0_58 = arith.constant 0 : index
    %96 = vector.load %arg13[%c0_56, %c0_57, %c0_58] : memref<2x1x32xf32, #tpu.memory_space<vmem>>, vector<1x1x32xf32>
    %97 = vector.shape_cast %96 : vector<1x1x32xf32> to vector<1x32xf32>
    %98 = vector.broadcast %97 : vector<1x32xf32> to vector<16x32xf32>
    %99 = arith.addf %95, %98 : vector<16x32xf32>
    %100 = arith.addf %81, %99 : vector<16x32xf32>
    %c0_59 = arith.constant 0 : index
    %c0_60 = arith.constant 0 : index
    %c0_61 = arith.constant 0 : index
    %101 = vector.load %arg16[%c0_59, %c0_60, %c0_61] : memref<2x1x32xf32, #tpu.memory_space<vmem>>, vector<1x1x32xf32>
    %102 = vector.shape_cast %101 : vector<1x1x32xf32> to vector<1x32xf32>
    %c0_62 = arith.constant 0 : index
    %c0_63 = arith.constant 0 : index
    %c0_64 = arith.constant 0 : index
    %103 = vector.load %arg17[%c0_62, %c0_63, %c0_64] : memref<2x1x32xf32, #tpu.memory_space<vmem>>, vector<1x1x32xf32>
    %104 = vector.shape_cast %103 : vector<1x1x32xf32> to vector<1x32xf32>
    %cst_65 = arith.constant dense<0.000000e+00> : vector<16xf32>
    %105 = vector.multi_reduction <add>, %100, %cst_65 [1] : vector<16x32xf32> to vector<16xf32>
    %106 = vector.shape_cast %105 : vector<16xf32> to vector<16x1xf32>
    %cst_66 = arith.constant 3.200000e+01 : f32
    %107 = vector.broadcast %cst_66 : f32 to vector<16x1xf32>
    %108 = arith.divf %106, %107 : vector<16x1xf32>
    %109 = vector.broadcast %108 : vector<16x1xf32> to vector<16x32xf32>
    %110 = arith.subf %100, %109 : vector<16x32xf32>
    %111 = arith.mulf %110, %110 : vector<16x32xf32>
    %cst_67 = arith.constant dense<0.000000e+00> : vector<16xf32>
    %112 = vector.multi_reduction <add>, %111, %cst_67 [1] : vector<16x32xf32> to vector<16xf32>
    %113 = vector.shape_cast %112 : vector<16xf32> to vector<16x1xf32>
    %cst_68 = arith.constant 3.200000e+01 : f32
    %114 = vector.broadcast %cst_68 : f32 to vector<16x1xf32>
    %115 = arith.divf %113, %114 : vector<16x1xf32>
    %116 = vector.broadcast %108 : vector<16x1xf32> to vector<16x32xf32>
    %117 = arith.subf %100, %116 : vector<16x32xf32>
    %cst_69 = arith.constant 9.99999974E-6 : f32
    %118 = vector.broadcast %cst_69 : f32 to vector<16x1xf32>
    %119 = arith.addf %115, %118 : vector<16x1xf32>
    %120 = math.rsqrt %119 : vector<16x1xf32>
    %121 = vector.broadcast %120 : vector<16x1xf32> to vector<16x32xf32>
    %122 = arith.mulf %117, %121 : vector<16x32xf32>
    %123 = vector.broadcast %102 : vector<1x32xf32> to vector<16x32xf32>
    %124 = arith.mulf %122, %123 : vector<16x32xf32>
    %125 = vector.broadcast %104 : vector<1x32xf32> to vector<16x32xf32>
    %126 = arith.addf %124, %125 : vector<16x32xf32>
    %127 = arith.addf %126, %1 : vector<16x32xf32>
    %128 = arith.truncf %127 : vector<16x32xf32> to vector<16x32xbf16>
    %c1 = arith.constant 1 : index
    %c0_70 = arith.constant 0 : index
    %c0_71 = arith.constant 0 : index
    %129 = vector.load %arg4[%c1, %c0_70, %c0_71] : memref<2x32x64xbf16, #tpu.memory_space<vmem>>, vector<1x32x64xbf16>
    %130 = vector.shape_cast %129 : vector<1x32x64xbf16> to vector<32x64xbf16>
    %cst_72 = arith.constant dense<0.000000e+00> : vector<16x64xf32>
    %131 = tpu.matmul %128, %130, %cst_72 {dimension_numbers = #tpu.dot_dimension_numbers<[1], [0], [0], [1], [0, 0, 1, 1], [], []>} : vector<16x32xbf16>, vector<32x64xbf16>, vector<16x64xf32> -> vector<16x64xf32>
    %c1_73 = arith.constant 1 : index
    %c0_74 = arith.constant 0 : index
    %c0_75 = arith.constant 0 : index
    %132 = vector.load %arg5[%c1_73, %c0_74, %c0_75] : memref<2x1x64xf32, #tpu.memory_space<vmem>>, vector<1x1x64xf32>
    %133 = vector.shape_cast %132 : vector<1x1x64xf32> to vector<1x64xf32>
    %134 = vector.broadcast %133 : vector<1x64xf32> to vector<16x64xf32>
    %135 = arith.addf %131, %134 : vector<16x64xf32>
    %136 = vector.extract_strided_slice %135 {offsets = [0, 0], sizes = [16, 32], strides = [1, 1]} : vector<16x64xf32> to vector<16x32xf32>
    %137 = vector.extract_strided_slice %135 {offsets = [0, 32], sizes = [16, 32], strides = [1, 1]} : vector<16x64xf32> to vector<16x32xf32>
    %138 = arith.truncf %126 : vector<16x32xf32> to vector<16x32xbf16>
    %c1_76 = arith.constant 1 : index
    %c0_77 = arith.constant 0 : index
    %c0_78 = arith.constant 0 : index
    %139 = vector.load %arg6[%c1_76, %c0_77, %c0_78] : memref<2x32x32xbf16, #tpu.memory_space<vmem>>, vector<1x32x32xbf16>
    %140 = vector.shape_cast %139 : vector<1x32x32xbf16> to vector<32x32xbf16>
    %cst_79 = arith.constant dense<0.000000e+00> : vector<16x32xf32>
    %141 = tpu.matmul %138, %140, %cst_79 {dimension_numbers = #tpu.dot_dimension_numbers<[1], [0], [0], [1], [0, 0, 1, 1], [], []>} : vector<16x32xbf16>, vector<32x32xbf16>, vector<16x32xf32> -> vector<16x32xf32>
    %c1_80 = arith.constant 1 : index
    %c0_81 = arith.constant 0 : index
    %c0_82 = arith.constant 0 : index
    %142 = vector.load %arg7[%c1_80, %c0_81, %c0_82] : memref<2x1x32xf32, #tpu.memory_space<vmem>>, vector<1x1x32xf32>
    %143 = vector.shape_cast %142 : vector<1x1x32xf32> to vector<1x32xf32>
    %144 = vector.broadcast %143 : vector<1x32xf32> to vector<16x32xf32>
    %145 = arith.addf %141, %144 : vector<16x32xf32>
    %146 = tpu.concatenate %137, %137, %137, %137 in 0 : vector<16x32xf32>, vector<16x32xf32>, vector<16x32xf32>, vector<16x32xf32> -> vector<64x32xf32>
    %147 = arith.mulf %146, %2 : vector<64x32xf32>
    %148 = arith.truncf %147 : vector<64x32xf32> to vector<64x32xbf16>
    %149 = tpu.concatenate %145, %145, %145, %145 in 0 : vector<16x32xf32>, vector<16x32xf32>, vector<16x32xf32>, vector<16x32xf32> -> vector<64x32xf32>
    %150 = arith.mulf %149, %2 : vector<64x32xf32>
    %151 = arith.truncf %150 : vector<64x32xf32> to vector<64x32xbf16>
    %152 = arith.truncf %136 : vector<16x32xf32> to vector<16x32xbf16>
    %cst_83 = arith.constant dense<0.000000e+00> : vector<16x64xf32>
    %153 = tpu.matmul %152, %148, %cst_83 {dimension_numbers = #tpu.dot_dimension_numbers<[1], [1], [0], [0], [0, 0, 1, 0], [], []>} : vector<16x32xbf16>, vector<64x32xbf16>, vector<16x64xf32> -> vector<16x64xf32>
    %cst_84 = arith.constant 0.353553385 : f32
    %154 = vector.broadcast %cst_84 : f32 to vector<16x64xf32>
    %155 = arith.mulf %153, %154 : vector<16x64xf32>
    %156 = arith.addf %155, %4 : vector<16x64xf32>
    %cst_85 = arith.constant dense<0xFF800000> : vector<16xf32>
    %157 = vector.multi_reduction <maximumf>, %156, %cst_85 [1] : vector<16x64xf32> to vector<16xf32>
    %158 = vector.shape_cast %157 : vector<16xf32> to vector<16x1xf32>
    %159 = vector.broadcast %158 : vector<16x1xf32> to vector<16x64xf32>
    %160 = arith.subf %156, %159 : vector<16x64xf32>
    %161 = math.exp %160 : vector<16x64xf32>
    %162 = arith.truncf %161 : vector<16x64xf32> to vector<16x64xbf16>
    %cst_86 = arith.constant dense<0.000000e+00> : vector<16x32xf32>
    %163 = tpu.matmul %162, %151, %cst_86 {dimension_numbers = #tpu.dot_dimension_numbers<[1], [0], [0], [1], [0, 0, 1, 1], [], []>} : vector<16x64xbf16>, vector<64x32xbf16>, vector<16x32xf32> -> vector<16x32xf32>
    %cst_87 = arith.constant dense<0.000000e+00> : vector<16x32xf32>
    %164 = tpu.matmul %162, %3, %cst_87 {dimension_numbers = #tpu.dot_dimension_numbers<[1], [0], [0], [1], [0, 0, 1, 1], [], []>} : vector<16x64xbf16>, vector<64x32xbf16>, vector<16x32xf32> -> vector<16x32xf32>
    %cst_88 = arith.constant 9.99999968E-21 : f32
    %165 = vector.broadcast %cst_88 : f32 to vector<16x32xf32>
    %166 = arith.maximumf %164, %165 : vector<16x32xf32>
    %167 = tpu.reciprocal %166 : vector<16x32xf32> -> vector<16x32xf32>
    %168 = arith.mulf %163, %167 : vector<16x32xf32>
    %169 = arith.truncf %168 : vector<16x32xf32> to vector<16x32xbf16>
    %c1_89 = arith.constant 1 : index
    %c0_90 = arith.constant 0 : index
    %c0_91 = arith.constant 0 : index
    %170 = vector.load %arg8[%c1_89, %c0_90, %c0_91] : memref<2x32x32xbf16, #tpu.memory_space<vmem>>, vector<1x32x32xbf16>
    %171 = vector.shape_cast %170 : vector<1x32x32xbf16> to vector<32x32xbf16>
    %cst_92 = arith.constant dense<0.000000e+00> : vector<16x32xf32>
    %172 = tpu.matmul %169, %171, %cst_92 {dimension_numbers = #tpu.dot_dimension_numbers<[1], [0], [0], [1], [0, 0, 1, 1], [], []>} : vector<16x32xbf16>, vector<32x32xbf16>, vector<16x32xf32> -> vector<16x32xf32>
    %c1_93 = arith.constant 1 : index
    %c0_94 = arith.constant 0 : index
    %c0_95 = arith.constant 0 : index
    %173 = vector.load %arg9[%c1_93, %c0_94, %c0_95] : memref<2x1x32xf32, #tpu.memory_space<vmem>>, vector<1x1x32xf32>
    %174 = vector.shape_cast %173 : vector<1x1x32xf32> to vector<1x32xf32>
    %175 = vector.broadcast %174 : vector<1x32xf32> to vector<16x32xf32>
    %176 = arith.addf %172, %175 : vector<16x32xf32>
    %177 = arith.addf %126, %176 : vector<16x32xf32>
    %c1_96 = arith.constant 1 : index
    %c0_97 = arith.constant 0 : index
    %c0_98 = arith.constant 0 : index
    %178 = vector.load %arg14[%c1_96, %c0_97, %c0_98] : memref<2x1x32xf32, #tpu.memory_space<vmem>>, vector<1x1x32xf32>
    %179 = vector.shape_cast %178 : vector<1x1x32xf32> to vector<1x32xf32>
    %c1_99 = arith.constant 1 : index
    %c0_100 = arith.constant 0 : index
    %c0_101 = arith.constant 0 : index
    %180 = vector.load %arg15[%c1_99, %c0_100, %c0_101] : memref<2x1x32xf32, #tpu.memory_space<vmem>>, vector<1x1x32xf32>
    %181 = vector.shape_cast %180 : vector<1x1x32xf32> to vector<1x32xf32>
    %cst_102 = arith.constant dense<0.000000e+00> : vector<16xf32>
    %182 = vector.multi_reduction <add>, %177, %cst_102 [1] : vector<16x32xf32> to vector<16xf32>
    %183 = vector.shape_cast %182 : vector<16xf32> to vector<16x1xf32>
    %cst_103 = arith.constant 3.200000e+01 : f32
    %184 = vector.broadcast %cst_103 : f32 to vector<16x1xf32>
    %185 = arith.divf %183, %184 : vector<16x1xf32>
    %186 = vector.broadcast %185 : vector<16x1xf32> to vector<16x32xf32>
    %187 = arith.subf %177, %186 : vector<16x32xf32>
    %188 = arith.mulf %187, %187 : vector<16x32xf32>
    %cst_104 = arith.constant dense<0.000000e+00> : vector<16xf32>
    %189 = vector.multi_reduction <add>, %188, %cst_104 [1] : vector<16x32xf32> to vector<16xf32>
    %190 = vector.shape_cast %189 : vector<16xf32> to vector<16x1xf32>
    %cst_105 = arith.constant 3.200000e+01 : f32
    %191 = vector.broadcast %cst_105 : f32 to vector<16x1xf32>
    %192 = arith.divf %190, %191 : vector<16x1xf32>
    %193 = vector.broadcast %185 : vector<16x1xf32> to vector<16x32xf32>
    %194 = arith.subf %177, %193 : vector<16x32xf32>
    %cst_106 = arith.constant 9.99999974E-6 : f32
    %195 = vector.broadcast %cst_106 : f32 to vector<16x1xf32>
    %196 = arith.addf %192, %195 : vector<16x1xf32>
    %197 = math.rsqrt %196 : vector<16x1xf32>
    %198 = vector.broadcast %197 : vector<16x1xf32> to vector<16x32xf32>
    %199 = arith.mulf %194, %198 : vector<16x32xf32>
    %200 = vector.broadcast %179 : vector<1x32xf32> to vector<16x32xf32>
    %201 = arith.mulf %199, %200 : vector<16x32xf32>
    %202 = vector.broadcast %181 : vector<1x32xf32> to vector<16x32xf32>
    %203 = arith.addf %201, %202 : vector<16x32xf32>
    %204 = arith.truncf %203 : vector<16x32xf32> to vector<16x32xbf16>
    %c1_107 = arith.constant 1 : index
    %c0_108 = arith.constant 0 : index
    %c0_109 = arith.constant 0 : index
    %205 = vector.load %arg10[%c1_107, %c0_108, %c0_109] : memref<2x32x64xbf16, #tpu.memory_space<vmem>>, vector<1x32x64xbf16>
    %206 = vector.shape_cast %205 : vector<1x32x64xbf16> to vector<32x64xbf16>
    %cst_110 = arith.constant dense<0.000000e+00> : vector<16x64xf32>
    %207 = tpu.matmul %204, %206, %cst_110 {dimension_numbers = #tpu.dot_dimension_numbers<[1], [0], [0], [1], [0, 0, 1, 1], [], []>} : vector<16x32xbf16>, vector<32x64xbf16>, vector<16x64xf32> -> vector<16x64xf32>
    %c1_111 = arith.constant 1 : index
    %c0_112 = arith.constant 0 : index
    %c0_113 = arith.constant 0 : index
    %208 = vector.load %arg11[%c1_111, %c0_112, %c0_113] : memref<2x1x64xf32, #tpu.memory_space<vmem>>, vector<1x1x64xf32>
    %209 = vector.shape_cast %208 : vector<1x1x64xf32> to vector<1x64xf32>
    %210 = vector.broadcast %209 : vector<1x64xf32> to vector<16x64xf32>
    %211 = arith.addf %207, %210 : vector<16x64xf32>
    %cst_114 = arith.constant 0.000000e+00 : f32
    %212 = vector.broadcast %cst_114 : f32 to vector<16x64xf32>
    %213 = arith.maximumf %211, %212 : vector<16x64xf32>
    %214 = arith.truncf %213 : vector<16x64xf32> to vector<16x64xbf16>
    %c1_115 = arith.constant 1 : index
    %c0_116 = arith.constant 0 : index
    %c0_117 = arith.constant 0 : index
    %215 = vector.load %arg12[%c1_115, %c0_116, %c0_117] : memref<2x64x32xbf16, #tpu.memory_space<vmem>>, vector<1x64x32xbf16>
    %216 = vector.shape_cast %215 : vector<1x64x32xbf16> to vector<64x32xbf16>
    %cst_118 = arith.constant dense<0.000000e+00> : vector<16x32xf32>
    %217 = tpu.matmul %214, %216, %cst_118 {dimension_numbers = #tpu.dot_dimension_numbers<[1], [0], [0], [1], [0, 0, 1, 1], [], []>} : vector<16x64xbf16>, vector<64x32xbf16>, vector<16x32xf32> -> vector<16x32xf32>
    %c1_119 = arith.constant 1 : index
    %c0_120 = arith.constant 0 : index
    %c0_121 = arith.constant 0 : index
    %218 = vector.load %arg13[%c1_119, %c0_120, %c0_121] : memref<2x1x32xf32, #tpu.memory_space<vmem>>, vector<1x1x32xf32>
    %219 = vector.shape_cast %218 : vector<1x1x32xf32> to vector<1x32xf32>
    %220 = vector.broadcast %219 : vector<1x32xf32> to vector<16x32xf32>
    %221 = arith.addf %217, %220 : vector<16x32xf32>
    %222 = arith.addf %203, %221 : vector<16x32xf32>
    %c1_122 = arith.constant 1 : index
    %c0_123 = arith.constant 0 : index
    %c0_124 = arith.constant 0 : index
    %223 = vector.load %arg16[%c1_122, %c0_123, %c0_124] : memref<2x1x32xf32, #tpu.memory_space<vmem>>, vector<1x1x32xf32>
    %224 = vector.shape_cast %223 : vector<1x1x32xf32> to vector<1x32xf32>
    %c1_125 = arith.constant 1 : index
    %c0_126 = arith.constant 0 : index
    %c0_127 = arith.constant 0 : index
    %225 = vector.load %arg17[%c1_125, %c0_126, %c0_127] : memref<2x1x32xf32, #tpu.memory_space<vmem>>, vector<1x1x32xf32>
    %226 = vector.shape_cast %225 : vector<1x1x32xf32> to vector<1x32xf32>
    %cst_128 = arith.constant dense<0.000000e+00> : vector<16xf32>
    %227 = vector.multi_reduction <add>, %222, %cst_128 [1] : vector<16x32xf32> to vector<16xf32>
    %228 = vector.shape_cast %227 : vector<16xf32> to vector<16x1xf32>
    %cst_129 = arith.constant 3.200000e+01 : f32
    %229 = vector.broadcast %cst_129 : f32 to vector<16x1xf32>
    %230 = arith.divf %228, %229 : vector<16x1xf32>
    %231 = vector.broadcast %230 : vector<16x1xf32> to vector<16x32xf32>
    %232 = arith.subf %222, %231 : vector<16x32xf32>
    %233 = arith.mulf %232, %232 : vector<16x32xf32>
    %cst_130 = arith.constant dense<0.000000e+00> : vector<16xf32>
    %234 = vector.multi_reduction <add>, %233, %cst_130 [1] : vector<16x32xf32> to vector<16xf32>
    %235 = vector.shape_cast %234 : vector<16xf32> to vector<16x1xf32>
    %cst_131 = arith.constant 3.200000e+01 : f32
    %236 = vector.broadcast %cst_131 : f32 to vector<16x1xf32>
    %237 = arith.divf %235, %236 : vector<16x1xf32>
    %238 = vector.broadcast %230 : vector<16x1xf32> to vector<16x32xf32>
    %239 = arith.subf %222, %238 : vector<16x32xf32>
    %cst_132 = arith.constant 9.99999974E-6 : f32
    %240 = vector.broadcast %cst_132 : f32 to vector<16x1xf32>
    %241 = arith.addf %237, %240 : vector<16x1xf32>
    %242 = math.rsqrt %241 : vector<16x1xf32>
    %243 = vector.broadcast %242 : vector<16x1xf32> to vector<16x32xf32>
    %244 = arith.mulf %239, %243 : vector<16x32xf32>
    %245 = vector.broadcast %224 : vector<1x32xf32> to vector<16x32xf32>
    %246 = arith.mulf %244, %245 : vector<16x32xf32>
    %247 = vector.broadcast %226 : vector<1x32xf32> to vector<16x32xf32>
    %248 = arith.addf %246, %247 : vector<16x32xf32>
    %c0_133 = arith.constant 0 : index
    %c0_134 = arith.constant 0 : index
    %249 = vector.load %arg18[%c0_133, %c0_134] : memref<16x32xf32, #tpu.memory_space<vmem>>, vector<16x32xf32>
    tpu.vector_store %arg18[%c0_133, %c0_134], %248 {strides = array<i32>} : memref<16x32xf32, #tpu.memory_space<vmem>>, vector<16x32xf32>,
    return
  }
}

</mosaic_0001>

<bundles_post_ra>
// kernel: transformer_encoder.1
= control target key start
LH: loop header
LB: loop body
LE: loop exit
PB: predicated region body
PF: predicated region fallthrough
CT: control target
= control target key end

     0   :  { %v1814_v0 = vmov 0.0   ;;  %vm1815_vm0 = vmmov 0   ;;  %s1816_s30 = smov 32   ;;  %vm104_vm1 = vcmask 261120   ;;  %vm346_vm2 = vcmask 523264   ;;  %s2367_s4 = inlined_call_operand.vmem [shape: bf16[2,32,64], index: 4, kind: input, shape index: {}]   ;;  %s2368_s0 = inlined_call_operand.vmem [shape: f32[16,32], index: 0, kind: input, shape index: {}]   ;;  %s2369_s1 = inlined_call_operand.vmem [shape: f32[16,32], index: 1, kind: input, shape index: {}]   ;;  %s2370_s2 = inlined_call_operand.vmem [shape: f32[64,32], index: 2, kind: input, shape index: {}]   ;;  %s2371_s5 = inlined_call_operand.vmem [shape: f32[2,1,64], index: 5, kind: input, shape index: {}]   ;;  %s2372_s6 = inlined_call_operand.vmem [shape: bf16[2,32,32], index: 6, kind: input, shape index: {}]   ;;  %s2373_s7 = inlined_call_operand.vmem [shape: f32[2,1,32], index: 7, kind: input, shape index: {}]   ;;  %s2374_s3 = inlined_call_operand.vmem [shape: f32[16,64], index: 3, kind: input, shape index: {}]   ;;  %s2375_s8 = inlined_call_operand.vmem [shape: bf16[2,32,32], index: 8, kind: input, shape index: {}]   ;;  %s2376_s9 = inlined_call_operand.vmem [shape: f32[2,1,32], index: 9, kind: input, shape index: {}]   ;;  %s2377_s10 = inlined_call_operand.vmem [shape: bf16[2,32,64], index: 10, kind: input, shape index: {}]   ;;  %s2378_s12 = inlined_call_operand.vmem [shape: bf16[2,64,32], index: 12, kind: input, shape index: {}]   ;;  %s2379_s14 = inlined_call_operand.vmem [shape: f32[2,1,32], index: 14, kind: input, shape index: {}]   ;;  %s2380_s15 = inlined_call_operand.vmem [shape: f32[2,1,32], index: 15, kind: input, shape index: {}]   ;;  %s2381_s11 = inlined_call_operand.vmem [shape: f32[2,1,64], index: 11, kind: input, shape index: {}]   ;;  %s2382_s13 = inlined_call_operand.vmem [shape: f32[2,1,32], index: 13, kind: input, shape index: {}]   ;;  %s2383_s16 = inlined_call_operand.vmem [shape: f32[2,1,32], index: 16, kind: input, shape index: {}]   ;;  %s2384_s17 = inlined_call_operand.vmem [shape: f32[2,1,32], index: 17, kind: input, shape index: {}]   ;;  %s2385_s18 = inlined_call_operand.vmem [shape: f32[16,32], index: 18, kind: output, shape index: {}]  }
   0x1   :  { %2389 = sst [smem:[#allocation2_spill]] %s2367_s4  ;;  %1594 = vmatprep.subr.bf16.mxu1 %v1814_v0  ;;  %1598 = vmatprep.mubr.msk.bf16.mxu1 %vm1815_vm0, %v1814_v0  ;;  %v1951_v8 = vld [vmem:[%s2370_s2 + $0x30] sm:$0xff]  ;;  %v1959_v10 = vld [vmem:[%s2370_s2 + $0x20] sm:$0xff]  ;;  %v1964_v11 = vld [vmem:[%s2370_s2 + $0x38] sm:$0xff] }
   0x2   :  { %2390 = sst [smem:[#allocation3_spill]] %s2368_s0  ;;  %1610 = vmatprep.subr.bf16.mxu0 %v1814_v0  ;;  %1618 = vmatprep.mubr.msk.bf16.mxu0 %vm1815_vm0, %v1814_v0  ;;  %v1970_v13 = vld [vmem:[%s2370_s2 + $0x28] sm:$0xff]  ;;  %v1979_v14 = vld [vmem:[%s2370_s2 + $0x10] sm:$0xff]  ;;  %v1984_v15 = vld [vmem:[%s2370_s2 + $0x18] sm:$0xff] }
   0x3   :  { %2391 = sst [smem:[#allocation4_spill]] %s2369_s1  ;;  %237 = vrot.lane.b32.xlu0 %v1951_v8, %s1816_s30  ;;  %233 = vrot.lane.b32.xlu1 %v1959_v10, %s1816_s30  ;;  %v1993_v16 = vld [vmem:[%s2370_s2] sm:$0xff]  ;;  %v1998_v17 = vld [vmem:[%s2370_s2 + $0x8] sm:$0xff]  ;;  %s1817_s2 = smov 96  }
   0x4   :  { %s2392_s29 = sld [smem:[#allocation2_spill]]  ;;  %v1439_v22 = vld [vmem:[%s2371_s5] ss:$0 sm:$0xff]  ;;  %v1760_v46 = vld [vmem:[%s2372_s6 + $0x8] sm:$0xff]  }
   0x5   :  { %s2393_s20 = sld [smem:[#allocation3_spill]]  ;;  %v1761_v47 = vld [vmem:[%s2372_s6] sm:$0xff]  }
   0x6   :  { %s2394_s24 = sld [smem:[#allocation4_spill]]  ;;  %v1443_v58 = vld [vmem:[%s2373_s7] ss:$0 sm:$0xff] }
   0x7   :  { %239 = vrot.lane.b32.xlu0 %v1964_v11, %s1816_s30  ;;  %235 = vrot.lane.b32.xlu1 %v1970_v13, %s1816_s30 }
   0xa   :  { %v1758_v1 = vld [vmem:[%s2392_s29 + $0x8] sm:$0xff]   ;;  %v1759_v2 = vld [vmem:[%s2392_s29] sm:$0xff]  }
   0xb   :  { %1595 = vmatpush3.bf16.msra.mxu1 %v1758_v1  ;;  %v1928_v3 = vld [vmem:[%s2393_s20] sm:$0xff]  ;;  %v1933_v4 = vld [vmem:[%s2393_s20 + $0x8] sm:$0xff]  ;;  %229 = vrot.lane.b32.xlu0 %v1979_v14, %s1816_s30 }
   0xc   :  { %v1938_v5 = vld [vmem:[%s2394_s24] sm:$0xff]  ;;  %1596 = vmatprep.subr.bf16.mxu1 %v1814_v0  ;;  %v1944_v6 = vld [vmem:[%s2394_s24 + $0x8] sm:$0xff]  ;;  %231 = vrot.lane.b32.xlu1 %v1984_v15, %s1816_s30  ;;  %v149_v48 = vpack.c.bf16 %v1933_v4, %v1928_v3 }
   0xd   :  { %v78_v7 = vadd.f32 %v1938_v5, %v1928_v3  ;;  %v79_v9 = vadd.f32 %v1944_v6, %v1933_v4 }
   0xf   :  { %1597 = vmatpush3.bf16.msra.mxu1 %v1759_v2  ;;  %v80_v12 = vpack.c.bf16 %v79_v9, %v78_v7  ;;  %225 = vrot.lane.b32.xlu0 %v1993_v16, %s1816_s30 }
  0x10   :  { %1602 = vmatprep.subr.bf16.mxu1 %v1814_v0  ;;  %227 = vrot.lane.b32.xlu1 %v1998_v17, %s1816_s30 }
  0x12   :  { %1599 = vmatmul.mubr.msk.bf16.vlgmr.msra.gmra.mxu1 %vm104_vm1, %v80_v12 }
  0x13   :  { %1606 = vmatprep.mubr.msk.bf16.mxu1 %vm1815_vm0, %v1814_v0  ;;  %1603 = vmatpush3.bf16.msra.mxu1 %v1760_v46 }
  0x14   :  { %1604 = vmatprep.subr.bf16.mxu1 %v1814_v0 }
  0x17   :  { %1605 = vmatpush3.bf16.msra.mxu1 %v1761_v47 }
  0x18   :  { %1622 = vmatprep.subr.bf16.mxu1 %v1814_v0 }
  0x1a   :  { %1607 = vmatmul.mubr.msk.bf16.vlgmr.msra.gmra.mxu1 %vm104_vm1, %v149_v48 }
  0x1b   :  { %1630 = vmatprep.mubr.msk.bf16.mxu1 %vm1815_vm0, %v1814_v0 }
  0x75   :  { %v2002_v18 = vpop.permute.xlu1 %233  ;;  %v2004_v19 = vpop.permute.xlu0 %237 }
  0x79   :  { %v2006_v20 = vpop.permute.xlu1 %235  ;;  %v2008_v21 = vpop.permute.xlu0 %239 }
  0x7d   :  { %v2015_v25 = vpop.permute.xlu0 %229 }
  0x7e   :  { %v2013_v24 = vpop.permute.xlu1 %231 }
  0x81   :  { %v2023_v36 = vpop.permute.xlu0 %225 }
  0x82   :  { %v2017_v30 = vpop.permute.xlu1 %227 }
  0xd2   :  { %v142_v23 = vpop.f32.mrf.mxu1 }
  0xd3   :  { %v143_v27 = vadd.f32 %v1439_v22, %v142_v23 }
  0xd4   :  { %v1600_v26 = vpop.f32.mrf.mxu1 }
  0xd5   :  { %v255_v32 = vmul.f32 %v2004_v19, %v143_v27  ;;  %v253_v34 = vmul.f32 %v2002_v18, %v143_v27  ;;  %v249_v42 = vmul.f32 %v2023_v36, %v143_v27  ;;  %v251_v43 = vmul.f32 %v2015_v25, %v143_v27  ;;  %v2069_v26 = vld [vmem:[%s2374_s3] sm:$0xff] }
  0xd6   :  { %v145_v28 = vpop.f32.mrf.mxu1 }
  0xd7   :  { %v146_v29 = vadd.f32 %v1439_v22, %v145_v28 }
  0xd8   :  { %v1601_v31 = vpop.f32.mrf.mxu1 }
  0xd9   :  { %v256_v33 = vmul.f32 %v2008_v21, %v146_v29  ;;  %v254_v35 = vmul.f32 %v2006_v20, %v146_v29  ;;  %v273_v37 = vpack.c.bf16 %v146_v29, %v143_v27  ;;  %v250_v38 = vmul.f32 %v2017_v30, %v146_v29 }
  0xda   :  { %v252_v41 = vmul.f32 %v2013_v24, %v146_v29  ;;  %v210_v57 = vpop.f32.mrf.mxu1 }
  0xdb   :  { %v260_v39 = vpack.c.bf16 %v256_v33, %v255_v32  ;;  %v259_v40 = vpack.c.bf16 %v254_v35, %v253_v34  ;;  %v257_v44 = vpack.c.bf16 %v250_v38, %v249_v42  ;;  %v211_v59 = vadd.f32 %v1443_v58, %v210_v57  ;;  %v2075_v32 = vld [vmem:[%s2374_s3 + $0x8] sm:$0xff] }
  0xdc   :  { %v258_v45 = vpack.c.bf16 %v252_v41, %v251_v43  ;;  %v1608_v60 = vpop.f32.mrf.mxu1  ;;  %v2108_v57 = vpack.c.bf16 %v1998_v17, %v1993_v16 }
  0xdd   :  { %284 = vrot.lane.b32.xlu0 %v260_v39, %s1817_s2  ;;  %282 = vrot.lane.b32.xlu1 %v259_v40, %s1817_s2  ;;  %v267_v62 = vmul.f32 %v211_v59, %v1951_v8  ;;  %v265_v2 = vmul.f32 %v211_v59, %v1959_v10  ;;  %v263_v39 = vmul.f32 %v211_v59, %v1979_v14 }
  0xde   :  { %v213_v61 = vpop.f32.mrf.mxu1  ;;  %v261_v41 = vmul.f32 %v211_v59, %v1993_v16  ;;  %v1763_v59 = vld [vmem:[%s2375_s8] sm:$0xff]  }
  0xdf   :  { %v214_v63 = vadd.f32 %v1443_v58, %v213_v61  ;;  %v1762_v58 = vld [vmem:[%s2375_s8 + $0x8] sm:$0xff]  }
  0xe0   :  { %v1609_v1 = vpop.f32.mrf.mxu1 }
  0xe1   :  { %280 = vrot.lane.b32.xlu0 %v258_v45, %s1817_s2  ;;  %278 = vrot.lane.b32.xlu1 %v257_v44, %s1817_s2  ;;  %v266_v7 = vmul.f32 %v214_v63, %v1970_v13  ;;  %v268_v9 = vmul.f32 %v214_v63, %v1964_v11  ;;  %v264_v40 = vmul.f32 %v214_v63, %v1984_v15 }
  0xe2   :  { %v262_v42 = vmul.f32 %v214_v63, %v1998_v17 }
  0xe3   :  { %v272_v12 = vpack.c.bf16 %v268_v9, %v267_v62  ;;  %v271_v22 = vpack.c.bf16 %v266_v7, %v265_v2  ;;  %v270_v43 = vpack.c.bf16 %v264_v40, %v263_v39 }
  0xe4   :  { %v269_v44 = vpack.c.bf16 %v262_v42, %v261_v41 }
  0xe5   :  { %1623 = vmatpush3.bf16.msra.mxu1 %v272_v12 }
  0xe6   :  { %1624 = vmatprep.subr.bf16.mxu1 %v1814_v0 }
  0xe9   :  { %1625 = vmatpush3.bf16.msra.mxu1 %v271_v22 }
  0xea   :  { %1626 = vmatprep.subr.bf16.mxu1 %v1814_v0 }
  0xed   :  { %1627 = vmatpush3.bf16.msra.mxu1 %v270_v43 }
  0xee   :  { %1628 = vmatprep.subr.bf16.mxu1 %v1814_v0 }
  0xf1   :  { %1629 = vmatpush3.bf16.msra.mxu1 %v269_v44 }
  0xf2   :  { %1634 = vmatprep.subr.bf16.mxu1 %v1814_v0 }
 0x14f   :  { %v285_v49 = vpop.permute.xlu0 %284  ;;  %v283_v51 = vpop.permute.xlu1 %282 }
 0x150   :  { %v299_v50 = vsel %vm104_vm1, %v285_v49, 0  ;;  %v296_v52 = vsel %vm104_vm1, %v283_v51, 0 }
 0x151   :  { %1611 = vmatpush3.bf16.xpose.msra.mxu0 %v299_v50 }
 0x152   :  { %1612 = vmatprep.subr.bf16.mxu0 %v1814_v0 }
 0x153   :  { %v281_v53 = vpop.permute.xlu0 %280  ;;  %v279_v55 = vpop.permute.xlu1 %278 }
 0x154   :  { %v293_v54 = vsel %vm104_vm1, %v281_v53, 0  ;;  %v290_v56 = vsel %vm104_vm1, %v279_v55, 0  ;;  %v2088_v53 = vpack.c.bf16 %v1964_v11, %v1951_v8  ;;  %v2094_v55 = vpack.c.bf16 %v1970_v13, %v1959_v10 }
 0x159   :  { %1613 = vmatpush3.bf16.xpose.msra.mxu0 %v296_v52 }
 0x15a   :  { %1614 = vmatprep.subr.bf16.mxu0 %v1814_v0 }
 0x161   :  { %1615 = vmatpush3.bf16.xpose.msra.mxu0 %v293_v54 }
 0x162   :  { %1616 = vmatprep.subr.bf16.mxu0 %v1814_v0 }
 0x169   :  { %1617 = vmatpush3.bf16.xpose.msra.mxu0 %v290_v56  ;;  %v2102_v56 = vpack.c.bf16 %v1984_v15, %v1979_v14 }
 0x16a   :  { %1646 = vmatprep.subr.bf16.mxu0 %v1814_v0 }
 0x170   :  { %1619 = vmatmul.mubr.msk.bf16.vlgmr.msra.gmra.mxu0 %vm104_vm1, %v273_v37 }
 0x171   :  { %1650 = vmatprep.mubr.msk.bf16.mxu0 %vm1815_vm0, %v1814_v0  ;;  %1647 = vmatpush3.bf16.msra.mxu0 %v1762_v58  ;;  %v1765_v58 = vld [vmem:[%s2377_s10] sm:$0xff]  }
 0x172   :  { %1648 = vmatprep.subr.bf16.mxu0 %v1814_v0 }
 0x175   :  { %1649 = vmatpush3.bf16.msra.mxu0 %v1763_v59  ;;  %v1766_v59 = vld [vmem:[%s2378_s12 + $0x18] sm:$0xff]  }
 0x176   :  { %1662 = vmatprep.subr.bf16.mxu0 %v1814_v0 }
 0x230   :  { %v335_v23 = vpop.f32.mrf.mxu0 }
 0x231   :  { %v342_v27 = vmul.f32 0.35355338, %v335_v23 }
 0x232   :  { %v1620_v28 = vpop.f32.mrf.mxu0 }
 0x233   :  { %v344_v29 = vadd.f32 %v342_v27, %v2069_v26 }
 0x234   :  { %v338_v31 = vpop.f32.mrf.mxu0 }
 0x235   :  { %v343_v33 = vmul.f32 0.35355338, %v338_v31  ;;  %v347_v34 = vsel %vm346_vm2, %v344_v29, -inf }
 0x236   :  { %348 = vmax.xlane.f32.xlu0 %v347_v34  ;;  %v1621_v35 = vpop.f32.mrf.mxu0 }
 0x237   :  { %v345_v37 = vadd.f32 %v343_v33, %v2075_v32  ;;  %v1450_v33 = vld [vmem:[%s2376_s9] ss:$0 sm:$0xff] }
 0x239   :  { %v350_v38 = vsel %vm346_vm2, %v345_v37, -inf }
 0x23a   :  { %351 = vmax.xlane.f32.xlu1 %v350_v38 }
 0x2bf   :  { %v349_v45 = vpop.xlane.xlu0 %348 }
 0x2c0   :  { %v353_v46 = vsub.f32 %v344_v29, %v349_v45 }
 0x2c2   :  { %v355_v47 = vmul.f32 1.442695, %v353_v46 }
 0x2c3   :  { %v352_v48 = vpop.xlane.xlu1 %351 }
 0x2c4   :  { %v354_v49 = vsub.f32 %v345_v37, %v352_v48  ;;  %1782 = vpow2.f32 %v355_v47 }
 0x2c6   :  { %v357_v50 = vmul.f32 1.442695, %v354_v49 }
 0x2c8   :  { %1784 = vpow2.f32 %v357_v50 }
 0x2d1   :  { %v1783_v51 = vpop.eup %1782 }
 0x2d5   :  { %v1785_v52 = vpop.eup %1784 }
 0x2d6   :  { %v359_v54 = vpack.c.bf16 %v1785_v52, %v1783_v51 }
 0x2d8   :  { %1631 = vmatmul.mubr.msk.bf16.vlgmr.msra.gmra.mxu1 %vm346_vm2, %v359_v54 }
 0x2d9   :  { %1635 = vmatpush3.bf16.msra.mxu1 %v2088_v53  ;;  %1642 = vmatprep.mubr.msk.bf16.mxu1 %vm1815_vm0, %v1814_v0 }
 0x2da   :  { %1636 = vmatprep.subr.bf16.mxu1 %v1814_v0 }
 0x2dd   :  { %1637 = vmatpush3.bf16.msra.mxu1 %v2094_v55 }
 0x2de   :  { %1638 = vmatprep.subr.bf16.mxu1 %v1814_v0 }
 0x2e1   :  { %1639 = vmatpush3.bf16.msra.mxu1 %v2102_v56 }
 0x2e2   :  { %1640 = vmatprep.subr.bf16.mxu1 %v1814_v0 }
 0x2e5   :  { %1641 = vmatpush3.bf16.msra.mxu1 %v2108_v57 }
 0x2e6   :  { %1654 = vmatprep.subr.bf16.mxu1 %v1814_v0 }
 0x2e8   :  { %1643 = vmatmul.mubr.msk.bf16.vlgmr.msra.gmra.mxu1 %vm346_vm2, %v359_v54 }
 0x2e9   :  { %1658 = vmatprep.mubr.msk.bf16.mxu1 %vm1815_vm0, %v1814_v0 }
 0x398   :  { %v397_v60 = vpop.f32.mrf.mxu1 }
 0x39a   :  { %v1632_v61 = vpop.f32.mrf.mxu1 }
 0x39c   :  { %v400_v62 = vpop.f32.mrf.mxu1 }
 0x39e   :  { %v1633_v63 = vpop.f32.mrf.mxu1 }
 0x3a8   :  { %v438_v1 = vpop.f32.mrf.mxu1 }
 0x3a9   :  { %v445_v2 = vmax.f32 %v438_v1, 1e-20 }
 0x3aa   :  { %v1644_v7 = vpop.f32.mrf.mxu1 }
 0x3ab   :  { %1786 = vrcp.f32 %v445_v2 }
 0x3ac   :  { %v441_v9 = vpop.f32.mrf.mxu1 }
 0x3ad   :  { %v446_v12 = vmax.f32 %v441_v9, 1e-20 }
 0x3ae   :  { %v1645_v22 = vpop.f32.mrf.mxu1 }
 0x3af   :  { %1788 = vrcp.f32 %v446_v12  ;;  %v1454_v12 = vld [vmem:[%s2379_s14] ss:$0 sm:$0xff] }
 0x3b8   :  { %v1787_v23 = vpop.eup %1786 }
 0x3b9   :  { %v449_v28 = vmul.f32 %v1787_v23, %v397_v60 }
 0x3bc   :  { %v1789_v27 = vpop.eup %1788 }
 0x3bd   :  { %v450_v29 = vmul.f32 %v1789_v27, %v400_v62 }
 0x3bf   :  { %v451_v31 = vpack.c.bf16 %v450_v29, %v449_v28  ;;  %v1455_v28 = vld [vmem:[%s2380_s15] ss:$0 sm:$0xff] }
 0x3c1   :  { %1651 = vmatmul.mubr.msk.bf16.vlgmr.msra.gmra.mxu0 %vm104_vm1, %v451_v31 }
 0x3c2   :  { %1670 = vmatprep.mubr.msk.bf16.mxu0 %vm1815_vm0, %v1814_v0  ;;  %1663 = vmatpush3.bf16.msra.mxu0 %v1766_v59 }
 0x3c3   :  { %1664 = vmatprep.subr.bf16.mxu0 %v1814_v0 }
 0x481   :  { %v512_v34 = vpop.f32.mrf.mxu0 }
 0x482   :  { %v513_v35 = vadd.f32 %v1450_v33, %v512_v34 }
 0x483   :  { %v1652_v37 = vpop.f32.mrf.mxu0 }
 0x484   :  { %v519_v38 = vadd.f32 %v513_v35, %v1928_v3  ;;  %v1767_v35 = vld [vmem:[%s2378_s12 + $0x10] sm:$0xff]   ;;  %v1768_v37 = vld [vmem:[%s2378_s12 + $0x8] sm:$0xff]  }
 0x485   :  { %v515_v39 = vpop.f32.mrf.mxu0  ;;  %1665 = vmatpush3.bf16.msra.mxu0 %v1767_v35 }
 0x486   :  { %v516_v40 = vadd.f32 %v1450_v33, %v515_v39  ;;  %v523_v41 = vsel %vm104_vm1, %v519_v38, 0.0  ;;  %1666 = vmatprep.subr.bf16.mxu0 %v1814_v0  ;;  %v1456_v39 = vld [vmem:[%s2381_s11] ss:$0 sm:$0xff] }
 0x487   :  { %524 = vadd.xlane.f32.xlu0 %v523_v41  ;;  %v1653_v42 = vpop.f32.mrf.mxu0 }
 0x488   :  { %v520_v43 = vadd.f32 %v516_v40, %v1933_v4  ;;  %v1764_v4 = vld [vmem:[%s2377_s10 + $0x8] sm:$0xff]  }
 0x489   :  { %1655 = vmatpush3.bf16.msra.mxu1 %v1764_v4  ;;  %1667 = vmatpush3.bf16.msra.mxu0 %v1768_v37 }
 0x48a   :  { %v526_v44 = vsel %vm104_vm1, %v520_v43, 0.0  ;;  %1656 = vmatprep.subr.bf16.mxu1 %v1814_v0  ;;  %1668 = vmatprep.subr.bf16.mxu0 %v1814_v0 }
 0x48b   :  { %527 = vadd.xlane.f32.xlu0 %v526_v44 }
 0x48d   :  { %1657 = vmatpush3.bf16.msra.mxu1 %v1765_v58 }
 0x48e   :  { %1674 = vmatprep.subr.bf16.mxu1 %v1814_v0 }
 0x510   :  { %v525_v45 = vpop.xlane.xlu0 %524 }
 0x511   :  { %v530_v46 = vmul.f32 0.03125, %v525_v45 }
 0x513   :  { %v532_v47 = vsub.f32 %v519_v38, %v530_v46  ;;  %v1769_v38 = vld [vmem:[%s2378_s12] sm:$0xff]  }
 0x514   :  { %v528_v48 = vpop.xlane.xlu0 %527  ;;  %1669 = vmatpush3.bf16.msra.mxu0 %v1769_v38 }
 0x515   :  { %v531_v49 = vmul.f32 0.03125, %v528_v48  ;;  %v534_v50 = vmul.f32 %v532_v47, %v532_v47  ;;  %1690 = vmatprep.subr.bf16.mxu0 %v1814_v0 }
 0x517   :  { %v533_v51 = vsub.f32 %v520_v43, %v531_v49  ;;  %v536_v3 = vsel %vm104_vm1, %v534_v50, 0.0  ;;  %v1460_v49 = vld [vmem:[%s2382_s13] ss:$0 sm:$0xff] }
 0x518   :  { %537 = vadd.xlane.f32.xlu1 %v536_v3 }
 0x519   :  { %v535_v52 = vmul.f32 %v533_v51, %v533_v51 }
 0x51b   :  { %v539_v54 = vsel %vm104_vm1, %v535_v52, 0.0 }
 0x51c   :  { %540 = vadd.xlane.f32.xlu0 %v539_v54 }
 0x5a1   :  { %v538_v60 = vpop.xlane.xlu1 %537 }
 0x5a2   :  { %v542_v61 = vmul.f32 0.03125, %v538_v60 }
 0x5a4   :  { %v544_v62 = vadd.f32 1e-05, %v542_v61 }
 0x5a5   :  { %v541_v63 = vpop.xlane.xlu0 %540 }
 0x5a6   :  { %1790 = vrsqrt.f32 %v544_v62  ;;  %v543_v1 = vmul.f32 0.03125, %v541_v63 }
 0x5a8   :  { %v545_v2 = vadd.f32 1e-05, %v543_v1 }
 0x5aa   :  { %1792 = vrsqrt.f32 %v545_v2 }
 0x5b3   :  { %v1791_v7 = vpop.eup %1790 }
 0x5b4   :  { %v548_v9 = vmul.f32 %v1791_v7, %v532_v47 }
 0x5b6   :  { %v556_v27 = vmul.f32 %v1454_v12, %v548_v9 }
 0x5b7   :  { %v1793_v22 = vpop.eup %1792 }
 0x5b8   :  { %v549_v23 = vmul.f32 %v1793_v22, %v533_v51  ;;  %v564_v31 = vadd.f32 %v1455_v28, %v556_v27 }
 0x5ba   :  { %v557_v29 = vmul.f32 %v1454_v12, %v549_v23 }
 0x5bc   :  { %v565_v33 = vadd.f32 %v1455_v28, %v557_v29  ;;  %v1770_v28 = vld [vmem:[%s2392_s29 + $0x18] sm:$0xff]   ;;  %v1771_v29 = vld [vmem:[%s2392_s29 + $0x10] sm:$0xff]  }
 0x5be   :  { %v566_v34 = vpack.c.bf16 %v565_v33, %v564_v31 }
 0x5c0   :  { %1659 = vmatmul.mubr.msk.bf16.vlgmr.msra.gmra.mxu1 %vm104_vm1, %v566_v34 }
 0x5c1   :  { %1678 = vmatprep.mubr.msk.bf16.mxu1 %vm1815_vm0, %v1814_v0  ;;  %1675 = vmatpush3.bf16.msra.mxu1 %v1770_v28 }
 0x5c2   :  { %1676 = vmatprep.subr.bf16.mxu1 %v1814_v0 }
 0x5c5   :  { %1677 = vmatpush3.bf16.msra.mxu1 %v1771_v29 }
 0x5c6   :  { %1682 = vmatprep.subr.bf16.mxu1 %v1814_v0 }
 0x680   :  { %v627_v40 = vpop.f32.mrf.mxu1 }
 0x681   :  { %v628_v42 = vadd.f32 %v1456_v39, %v627_v40  ;;  %v1466_v40 = vld [vmem:[%s2383_s16] ss:$0 sm:$0xff] }
 0x682   :  { %v1660_v41 = vpop.f32.mrf.mxu1 }
 0x683   :  { %v634_v46 = vmax.f32 %v628_v42, 0.0 }
 0x684   :  { %v630_v43 = vpop.f32.mrf.mxu1 }
 0x685   :  { %v631_v44 = vadd.f32 %v1456_v39, %v630_v43 }
 0x686   :  { %v1661_v45 = vpop.f32.mrf.mxu1 }
 0x687   :  { %v635_v47 = vmax.f32 %v631_v44, 0.0  ;;  %v1467_v44 = vld [vmem:[%s2384_s17] ss:$0 sm:$0xff] }
 0x689   :  { %v636_v48 = vpack.c.bf16 %v635_v47, %v634_v46 }
 0x68b   :  { %1671 = vmatmul.mubr.msk.bf16.vlgmr.msra.gmra.mxu0 %vm346_vm2, %v636_v48 }
 0x68c   :  { %1698 = vmatprep.mubr.msk.bf16.mxu0 %vm1815_vm0, %v1814_v0 }
 0x74b   :  { %v713_v50 = vpop.f32.mrf.mxu0 }
 0x74c   :  { %v714_v51 = vadd.f32 %v1460_v49, %v713_v50 }
 0x74d   :  { %v1672_v3 = vpop.f32.mrf.mxu0 }
 0x74e   :  { %v720_v52 = vadd.f32 %v714_v51, %v564_v31  ;;  %v1772_v51 = vld [vmem:[%s2372_s6 + $0x18] sm:$0xff]  }
 0x74f   :  { %v716_v54 = vpop.f32.mrf.mxu0 }
 0x750   :  { %v717_v4 = vadd.f32 %v1460_v49, %v716_v54  ;;  %v724_v58 = vsel %vm104_vm1, %v720_v52, 0.0 }
 0x751   :  { %725 = vadd.xlane.f32.xlu1 %v724_v58  ;;  %v1673_v59 = vpop.f32.mrf.mxu0 }
 0x752   :  { %v721_v60 = vadd.f32 %v717_v4, %v565_v33 }
 0x754   :  { %v727_v61 = vsel %vm104_vm1, %v721_v60, 0.0 }
 0x755   :  { %728 = vadd.xlane.f32.xlu0 %v727_v61 }
 0x7da   :  { %v726_v62 = vpop.xlane.xlu1 %725 }
 0x7db   :  { %v730_v63 = vmul.f32 0.03125, %v726_v62 }
 0x7dd   :  { %v732_v1 = vsub.f32 %v720_v52, %v730_v63  ;;  %v1773_v52 = vld [vmem:[%s2372_s6 + $0x10] sm:$0xff]  }
 0x7de   :  { %v729_v2 = vpop.xlane.xlu0 %728 }
 0x7df   :  { %v731_v7 = vmul.f32 0.03125, %v729_v2  ;;  %v734_v9 = vmul.f32 %v732_v1, %v732_v1 }
 0x7e1   :  { %v733_v12 = vsub.f32 %v721_v60, %v731_v7  ;;  %v736_v22 = vsel %vm104_vm1, %v734_v9, 0.0  ;;  %v1482_v7 = vld [vmem:[%s2373_s7 + $0x1] ss:$0 sm:$0xff] }
 0x7e2   :  { %737 = vadd.xlane.f32.xlu1 %v736_v22 }
 0x7e3   :  { %v735_v23 = vmul.f32 %v733_v12, %v733_v12 }
 0x7e5   :  { %v739_v27 = vsel %vm104_vm1, %v735_v23, 0.0 }
 0x7e6   :  { %740 = vadd.xlane.f32.xlu0 %v739_v27 }
 0x86b   :  { %v738_v31 = vpop.xlane.xlu1 %737 }
 0x86c   :  { %v742_v33 = vmul.f32 0.03125, %v738_v31 }
 0x86e   :  { %v744_v34 = vadd.f32 1e-05, %v742_v33 }
 0x86f   :  { %v741_v35 = vpop.xlane.xlu0 %740 }
 0x870   :  { %1794 = vrsqrt.f32 %v744_v34  ;;  %v743_v37 = vmul.f32 0.03125, %v741_v35 }
 0x872   :  { %v745_v38 = vadd.f32 1e-05, %v743_v37 }
 0x874   :  { %1796 = vrsqrt.f32 %v745_v38 }
 0x87d   :  { %v1795_v39 = vpop.eup %1794 }
 0x87e   :  { %v748_v41 = vmul.f32 %v1795_v39, %v732_v1 }
 0x880   :  { %v756_v42 = vmul.f32 %v1466_v40, %v748_v41 }
 0x881   :  { %v1797_v43 = vpop.eup %1796 }
 0x882   :  { %v749_v45 = vmul.f32 %v1797_v43, %v733_v12  ;;  %v2196_v47 = vadd.f32 %v1467_v44, %v756_v42 }
 0x884   :  { %v757_v46 = vmul.f32 %v1466_v40, %v749_v45  ;;  %v766_v49 = vadd.f32 %v2196_v47, %v1938_v5 }
 0x886   :  { %v2198_v48 = vadd.f32 %v1467_v44, %v757_v46 }
 0x888   :  { %v767_v50 = vadd.f32 %v2198_v48, %v1944_v6  ;;  %v838_v5 = vpack.c.bf16 %v2198_v48, %v2196_v47  ;;  %v1473_v6 = vld [vmem:[%s2371_s5 + $0x1] ss:$0 sm:$0xff] }
 0x88a   :  { %v768_v3 = vpack.c.bf16 %v767_v50, %v766_v49 }
 0x88c   :  { %1679 = vmatmul.mubr.msk.bf16.vlgmr.msra.gmra.mxu1 %vm104_vm1, %v768_v3 }
 0x88d   :  { %1683 = vmatpush3.bf16.msra.mxu1 %v1772_v51  ;;  %1686 = vmatprep.mubr.msk.bf16.mxu1 %vm1815_vm0, %v1814_v0 }
 0x88e   :  { %1684 = vmatprep.subr.bf16.mxu1 %v1814_v0 }
 0x891   :  { %1685 = vmatpush3.bf16.msra.mxu1 %v1773_v52 }
 0x892   :  { %1702 = vmatprep.subr.bf16.mxu1 %v1814_v0 }
 0x894   :  { %1687 = vmatmul.mubr.msk.bf16.vlgmr.msra.gmra.mxu1 %vm104_vm1, %v838_v5 }
 0x895   :  { %1710 = vmatprep.mubr.msk.bf16.mxu1 %vm1815_vm0, %v1814_v0 }
 0x94c   :  { %v831_v54 = vpop.f32.mrf.mxu1 }
 0x94d   :  { %v2223_v58 = vadd.f32 %v1473_v6, %v831_v54 }
 0x94e   :  { %v1680_v4 = vpop.f32.mrf.mxu1 }
 0x94f   :  { %v914_v62 = vmul.f32 %v2223_v58, %v2004_v19  ;;  %v912_v1 = vmul.f32 %v2223_v58, %v2002_v18  ;;  %v910_v18 = vmul.f32 %v2223_v58, %v2015_v25  ;;  %v908_v35 = vmul.f32 %v2223_v58, %v2023_v36 }
 0x950   :  { %v834_v59 = vpop.f32.mrf.mxu1 }
 0x951   :  { %v2225_v60 = vadd.f32 %v1473_v6, %v834_v59 }
 0x952   :  { %v1681_v61 = vpop.f32.mrf.mxu1 }
 0x953   :  { %v915_v63 = vmul.f32 %v2225_v60, %v2008_v21  ;;  %v913_v2 = vmul.f32 %v2225_v60, %v2006_v20  ;;  %v932_v12 = vpack.c.bf16 %v2225_v60, %v2223_v58  ;;  %v911_v19 = vmul.f32 %v2225_v60, %v2013_v24 }
 0x954   :  { %v901_v9 = vpop.f32.mrf.mxu1  ;;  %v909_v31 = vmul.f32 %v2225_v60, %v2017_v30 }
 0x955   :  { %v919_v22 = vpack.c.bf16 %v915_v63, %v914_v62  ;;  %v918_v23 = vpack.c.bf16 %v913_v2, %v912_v1  ;;  %v902_v27 = vadd.f32 %v1482_v7, %v901_v9  ;;  %v917_v29 = vpack.c.bf16 %v911_v19, %v910_v18 }
 0x956   :  { %v1688_v21 = vpop.f32.mrf.mxu1  ;;  %v916_v37 = vpack.c.bf16 %v909_v31, %v908_v35 }
 0x957   :  { %943 = vrot.lane.b32.xlu1 %v919_v22, %s1817_s2  ;;  %941 = vrot.lane.b32.xlu0 %v918_v23, %s1817_s2  ;;  %v926_v34 = vmul.f32 %v902_v27, %v1951_v8  ;;  %v924_v39 = vmul.f32 %v902_v27, %v1959_v10  ;;  %v920_v40 = vmul.f32 %v902_v27, %v1993_v16 }
 0x958   :  { %v904_v20 = vpop.f32.mrf.mxu1 }
 0x959   :  { %v905_v28 = vadd.f32 %v1482_v7, %v904_v20 }
 0x95a   :  { %v1689_v33 = vpop.f32.mrf.mxu1 }
 0x95b   :  { %v927_v24 = vmul.f32 %v905_v28, %v1964_v11  ;;  %939 = vrot.lane.b32.xlu1 %v917_v29, %s1817_s2  ;;  %v925_v25 = vmul.f32 %v905_v28, %v1970_v13  ;;  %v923_v8 = vmul.f32 %v905_v28, %v1984_v15  ;;  %v922_v11 = vmul.f32 %v902_v27, %v1979_v14  ;;  %v1494_v29 = vld [vmem:[%s2376_s9 + $0x1] ss:$0 sm:$0xff] }
 0x95c   :  { %v921_v36 = vmul.f32 %v905_v28, %v1998_v17 }
 0x95d   :  { %v931_v38 = vpack.c.bf16 %v927_v24, %v926_v34  ;;  %v930_v30 = vpack.c.bf16 %v925_v25, %v924_v39  ;;  %v929_v13 = vpack.c.bf16 %v923_v8, %v922_v11 }
 0x95e   :  { %v928_v10 = vpack.c.bf16 %v921_v36, %v920_v40 }
 0x95f   :  { %937 = vrot.lane.b32.xlu1 %v916_v37, %s1817_s2  ;;  %1703 = vmatpush3.bf16.msra.mxu1 %v931_v38 }
 0x960   :  { %1704 = vmatprep.subr.bf16.mxu1 %v1814_v0 }
 0x963   :  { %1705 = vmatpush3.bf16.msra.mxu1 %v930_v30 }
 0x964   :  { %1706 = vmatprep.subr.bf16.mxu1 %v1814_v0 }
 0x967   :  { %1707 = vmatpush3.bf16.msra.mxu1 %v929_v13 }
 0x968   :  { %1708 = vmatprep.subr.bf16.mxu1 %v1814_v0 }
 0x96b   :  { %1709 = vmatpush3.bf16.msra.mxu1 %v928_v10 }
 0x96c   :  { %1714 = vmatprep.subr.bf16.mxu1 %v1814_v0 }
 0x9c9   :  { %v944_v41 = vpop.permute.xlu1 %943  ;;  %v942_v14 = vpop.permute.xlu0 %941 }
 0x9ca   :  { %v958_v15 = vsel %vm104_vm1, %v944_v41, 0  ;;  %v955_v42 = vsel %vm104_vm1, %v942_v14, 0 }
 0x9cb   :  { %1691 = vmatpush3.bf16.xpose.msra.mxu0 %v958_v15 }
 0x9cc   :  { %1692 = vmatprep.subr.bf16.mxu0 %v1814_v0 }
 0x9cd   :  { %v940_v16 = vpop.permute.xlu1 %939 }
 0x9ce   :  { %v952_v17 = vsel %vm104_vm1, %v940_v16, 0  ;;  %v1778_v16 = vld [vmem:[%s2378_s12 + $0x38] sm:$0xff]  }
 0x9d1   :  { %v938_v43 = vpop.permute.xlu1 %937 }
 0x9d2   :  { %v949_v44 = vsel %vm104_vm1, %v938_v43, 0 }
 0x9d3   :  { %1693 = vmatpush3.bf16.xpose.msra.mxu0 %v955_v42  ;;  %v1777_v42 = vld [vmem:[%s2377_s10 + $0x10] sm:$0xff]  }
 0x9d4   :  { %1694 = vmatprep.subr.bf16.mxu0 %v1814_v0 }
 0x9db   :  { %1695 = vmatpush3.bf16.xpose.msra.mxu0 %v952_v17 }
 0x9dc   :  { %1696 = vmatprep.subr.bf16.mxu0 %v1814_v0 }
 0x9e3   :  { %1697 = vmatpush3.bf16.xpose.msra.mxu0 %v949_v44 }
 0x9e4   :  { %1726 = vmatprep.subr.bf16.mxu0 %v1814_v0 }
 0x9ea   :  { %1699 = vmatmul.mubr.msk.bf16.vlgmr.msra.gmra.mxu0 %vm104_vm1, %v932_v12 }
 0x9eb   :  { %1730 = vmatprep.mubr.msk.bf16.mxu0 %vm1815_vm0, %v1814_v0 }
 0xaaa   :  { %v994_v45 = vpop.f32.mrf.mxu0 }
 0xaab   :  { %v1001_v46 = vmul.f32 0.35355338, %v994_v45 }
 0xaac   :  { %v1700_v49 = vpop.f32.mrf.mxu0 }
 0xaad   :  { %v1003_v50 = vadd.f32 %v1001_v46, %v2069_v26 }
 0xaae   :  { %v997_v51 = vpop.f32.mrf.mxu0 }
 0xaaf   :  { %v1002_v3 = vmul.f32 0.35355338, %v997_v51  ;;  %v1005_v52 = vsel %vm346_vm2, %v1003_v50, -inf }
 0xab0   :  { %1006 = vmax.xlane.f32.xlu0 %v1005_v52  ;;  %v1701_v5 = vpop.f32.mrf.mxu0 }
 0xab1   :  { %v1004_v6 = vadd.f32 %v1002_v3, %v2075_v32  ;;  %v1774_v32 = vld [vmem:[%s2375_s8 + $0x18] sm:$0xff]   ;;  %v1500_v3 = vld [vmem:[%s2379_s14 + $0x1] ss:$0 sm:$0xff] }
 0xab2   :  { %1727 = vmatpush3.bf16.msra.mxu0 %v1774_v32 }
 0xab3   :  { %v1008_v54 = vsel %vm346_vm2, %v1004_v6, -inf  ;;  %1728 = vmatprep.subr.bf16.mxu0 %v1814_v0 }
 0xab4   :  { %1009 = vmax.xlane.f32.xlu1 %v1008_v54  ;;  %v1501_v54 = vld [vmem:[%s2380_s15 + $0x1] ss:$0 sm:$0xff] }
 0xb39   :  { %v1007_v4 = vpop.xlane.xlu0 %1006 }
 0xb3a   :  { %v1011_v58 = vsub.f32 %v1003_v50, %v1007_v4 }
 0xb3c   :  { %v1013_v59 = vmul.f32 1.442695, %v1011_v58 }
 0xb3d   :  { %v1010_v60 = vpop.xlane.xlu1 %1009 }
 0xb3e   :  { %v1012_v61 = vsub.f32 %v1004_v6, %v1010_v60  ;;  %1798 = vpow2.f32 %v1013_v59 }
 0xb40   :  { %v1015_v62 = vmul.f32 1.442695, %v1012_v61  ;;  %v1779_v61 = vld [vmem:[%s2378_s12 + $0x30] sm:$0xff]  }
 0xb42   :  { %1800 = vpow2.f32 %v1015_v62  ;;  %v1780_v62 = vld [vmem:[%s2378_s12 + $0x28] sm:$0xff]  }
 0xb4b   :  { %v1799_v26 = vpop.eup %1798 }
 0xb4f   :  { %v1801_v63 = vpop.eup %1800 }
 0xb50   :  { %v1017_v1 = vpack.c.bf16 %v1801_v63, %v1799_v26  ;;  %v1781_v26 = vld [vmem:[%s2378_s12 + $0x20] sm:$0xff]  }
 0xb51   :  { %v1507_v63 = vld [vmem:[%s2381_s11 + $0x1] ss:$0 sm:$0xff] }
 0xb52   :  { %1711 = vmatmul.mubr.msk.bf16.vlgmr.msra.gmra.mxu1 %vm346_vm2, %v1017_v1 }
 0xb53   :  { %1715 = vmatpush3.bf16.msra.mxu1 %v2088_v53  ;;  %1722 = vmatprep.mubr.msk.bf16.mxu1 %vm1815_vm0, %v1814_v0  ;;  %v1775_v53 = vld [vmem:[%s2375_s8 + $0x10] sm:$0xff]  }
 0xb54   :  { %1716 = vmatprep.subr.bf16.mxu1 %v1814_v0  ;;  %1729 = vmatpush3.bf16.msra.mxu0 %v1775_v53 }
 0xb55   :  { %1742 = vmatprep.subr.bf16.mxu0 %v1814_v0 }
 0xb57   :  { %1717 = vmatpush3.bf16.msra.mxu1 %v2094_v55 }
 0xb58   :  { %1718 = vmatprep.subr.bf16.mxu1 %v1814_v0 }
 0xb5b   :  { %1719 = vmatpush3.bf16.msra.mxu1 %v2102_v56 }
 0xb5c   :  { %1720 = vmatprep.subr.bf16.mxu1 %v1814_v0 }
 0xb5f   :  { %1721 = vmatpush3.bf16.msra.mxu1 %v2108_v57 }
 0xb60   :  { %1734 = vmatprep.subr.bf16.mxu1 %v1814_v0 }
 0xb62   :  { %1723 = vmatmul.mubr.msk.bf16.vlgmr.msra.gmra.mxu1 %vm346_vm2, %v1017_v1 }
 0xb63   :  { %1738 = vmatprep.mubr.msk.bf16.mxu1 %vm1815_vm0, %v1814_v0 }
 0xc12   :  { %v1055_v55 = vpop.f32.mrf.mxu1 }
 0xc14   :  { %v1712_v56 = vpop.f32.mrf.mxu1 }
 0xc16   :  { %v1058_v57 = vpop.f32.mrf.mxu1 }
 0xc18   :  { %v1713_v2 = vpop.f32.mrf.mxu1 }
 0xc22   :  { %v1096_v7 = vpop.f32.mrf.mxu1 }
 0xc23   :  { %v1103_v9 = vmax.f32 %v1096_v7, 1e-20 }
 0xc24   :  { %v1724_v12 = vpop.f32.mrf.mxu1 }
 0xc25   :  { %1802 = vrcp.f32 %v1103_v9 }
 0xc26   :  { %v1099_v22 = vpop.f32.mrf.mxu1 }
 0xc27   :  { %v1104_v23 = vmax.f32 %v1099_v22, 1e-20 }
 0xc28   :  { %v1725_v19 = vpop.f32.mrf.mxu1 }
 0xc29   :  { %1804 = vrcp.f32 %v1104_v23 }
 0xc32   :  { %v1803_v21 = vpop.eup %1802 }
 0xc33   :  { %v1107_v18 = vmul.f32 %v1803_v21, %v1055_v55 }
 0xc36   :  { %v1805_v27 = vpop.eup %1804 }
 0xc37   :  { %v1108_v20 = vmul.f32 %v1805_v27, %v1058_v57 }
 0xc39   :  { %v1109_v28 = vpack.c.bf16 %v1108_v20, %v1107_v18 }
 0xc3b   :  { %1731 = vmatmul.mubr.msk.bf16.vlgmr.msra.gmra.mxu0 %vm104_vm1, %v1109_v28 }
 0xc3c   :  { %1750 = vmatprep.mubr.msk.bf16.mxu0 %vm1815_vm0, %v1814_v0  ;;  %1743 = vmatpush3.bf16.msra.mxu0 %v1778_v16 }
 0xc3d   :  { %1744 = vmatprep.subr.bf16.mxu0 %v1814_v0 }
 0xc40   :  { %1745 = vmatpush3.bf16.msra.mxu0 %v1779_v61 }
 0xc41   :  { %1746 = vmatprep.subr.bf16.mxu0 %v1814_v0 }
 0xc44   :  { %1747 = vmatpush3.bf16.msra.mxu0 %v1780_v62 }
 0xc45   :  { %1748 = vmatprep.subr.bf16.mxu0 %v1814_v0 }
 0xc48   :  { %1749 = vmatpush3.bf16.msra.mxu0 %v1781_v26 }
 0xcfb   :  { %v1172_v31 = vpop.f32.mrf.mxu0 }
 0xcfc   :  { %v1173_v33 = vadd.f32 %v1494_v29, %v1172_v31 }
 0xcfd   :  { %v1732_v34 = vpop.f32.mrf.mxu0 }
 0xcfe   :  { %v1179_v24 = vadd.f32 %v1173_v33, %v2196_v47 }
 0xcff   :  { %v1175_v35 = vpop.f32.mrf.mxu0 }
 0xd00   :  { %v1176_v25 = vadd.f32 %v1494_v29, %v1175_v35  ;;  %v1185_v37 = vsel %vm104_vm1, %v1179_v24, 0.0 }
 0xd01   :  { %1186 = vadd.xlane.f32.xlu0 %v1185_v37  ;;  %v1733_v38 = vpop.f32.mrf.mxu0 }
 0xd02   :  { %v1180_v39 = vadd.f32 %v1176_v25, %v2198_v48  ;;  %v1776_v48 = vld [vmem:[%s2377_s10 + $0x18] sm:$0xff]  }
 0xd03   :  { %1735 = vmatpush3.bf16.msra.mxu1 %v1776_v48 }
 0xd04   :  { %v1188_v8 = vsel %vm104_vm1, %v1180_v39, 0.0  ;;  %1736 = vmatprep.subr.bf16.mxu1 %v1814_v0  ;;  %v1520_v0 = vld [vmem:[%s2382_s13 + $0x1] ss:$0 sm:$0xff] }
 0xd05   :  { %1189 = vadd.xlane.f32.xlu0 %v1188_v8 }
 0xd07   :  { %1737 = vmatpush3.bf16.msra.mxu1 %v1777_v42 }
 0xd8a   :  { %v1187_v30 = vpop.xlane.xlu0 %1186 }
 0xd8b   :  { %v1191_v11 = vmul.f32 0.03125, %v1187_v30 }
 0xd8d   :  { %v1193_v36 = vsub.f32 %v1179_v24, %v1191_v11 }
 0xd8e   :  { %v1190_v13 = vpop.xlane.xlu0 %1189 }
 0xd8f   :  { %v1192_v40 = vmul.f32 0.03125, %v1190_v13  ;;  %v1195_v10 = vmul.f32 %v1193_v36, %v1193_v36 }
 0xd91   :  { %v1194_v41 = vsub.f32 %v1180_v39, %v1192_v40  ;;  %v1197_v47 = vsel %vm104_vm1, %v1195_v10, 0.0 }
 0xd92   :  { %1198 = vadd.xlane.f32.xlu1 %v1197_v47  ;;  %v1528_v47 = vld [vmem:[%s2383_s16 + $0x1] ss:$0 sm:$0xff] }
 0xd93   :  { %v1196_v15 = vmul.f32 %v1194_v41, %v1194_v41 }
 0xd95   :  { %v1200_v14 = vsel %vm104_vm1, %v1196_v15, 0.0 }
 0xd96   :  { %1201 = vadd.xlane.f32.xlu0 %v1200_v14  ;;  %v1529_v14 = vld [vmem:[%s2384_s17 + $0x1] ss:$0 sm:$0xff] }
 0xe1b   :  { %v1199_v17 = vpop.xlane.xlu1 %1198 }
 0xe1c   :  { %v1203_v43 = vmul.f32 0.03125, %v1199_v17 }
 0xe1e   :  { %v1205_v44 = vadd.f32 1e-05, %v1203_v43 }
 0xe1f   :  { %v1202_v45 = vpop.xlane.xlu0 %1201 }
 0xe20   :  { %1806 = vrsqrt.f32 %v1205_v44  ;;  %v1204_v46 = vmul.f32 0.03125, %v1202_v45 }
 0xe22   :  { %v1206_v49 = vadd.f32 1e-05, %v1204_v46 }
 0xe24   :  { %1808 = vrsqrt.f32 %v1206_v49 }
 0xe2d   :  { %v1807_v50 = vpop.eup %1806 }
 0xe2e   :  { %v1209_v51 = vmul.f32 %v1807_v50, %v1193_v36 }
 0xe30   :  { %v1217_v6 = vmul.f32 %v1500_v3, %v1209_v51 }
 0xe31   :  { %v1809_v52 = vpop.eup %1808 }
 0xe32   :  { %v1210_v5 = vmul.f32 %v1809_v52, %v1194_v41  ;;  %v1225_v58 = vadd.f32 %v1501_v54, %v1217_v6 }
 0xe34   :  { %v1218_v4 = vmul.f32 %v1500_v3, %v1210_v5 }
 0xe36   :  { %v1226_v59 = vadd.f32 %v1501_v54, %v1218_v4 }
 0xe38   :  { %v1227_v60 = vpack.c.bf16 %v1226_v59, %v1225_v58 }
 0xe3a   :  { %1739 = vmatmul.mubr.msk.bf16.vlgmr.msra.gmra.mxu1 %vm104_vm1, %v1227_v60 }
 0xefa   :  { %v1290_v1 = vpop.f32.mrf.mxu1 }
 0xefb   :  { %v1291_v53 = vadd.f32 %v1507_v63, %v1290_v1 }
 0xefc   :  { %v1740_v32 = vpop.f32.mrf.mxu1 }
 0xefd   :  { %v1297_v2 = vmax.f32 %v1291_v53, 0.0 }
 0xefe   :  { %v1293_v55 = vpop.f32.mrf.mxu1 }
 0xeff   :  { %v1294_v56 = vadd.f32 %v1507_v63, %v1293_v55 }
 0xf00   :  { %v1741_v57 = vpop.f32.mrf.mxu1 }
 0xf01   :  { %v1298_v7 = vmax.f32 %v1294_v56, 0.0 }
 0xf03   :  { %v1299_v9 = vpack.c.bf16 %v1298_v7, %v1297_v2 }
 0xf05   :  { %1751 = vmatmul.mubr.msk.bf16.vlgmr.msra.gmra.mxu0 %vm346_vm2, %v1299_v9 }
 0xfc5   :  { %v1378_v12 = vpop.f32.mrf.mxu0 }
 0xfc6   :  { %v1379_v22 = vadd.f32 %v1520_v0, %v1378_v12 }
 0xfc7   :  { %v1752_v23 = vpop.f32.mrf.mxu0 }
 0xfc8   :  { %v1385_v19 = vadd.f32 %v1379_v22, %v1225_v58 }
 0xfc9   :  { %v1381_v21 = vpop.f32.mrf.mxu0 }
 0xfca   :  { %v1382_v27 = vadd.f32 %v1520_v0, %v1381_v21  ;;  %v1391_v18 = vsel %vm104_vm1, %v1385_v19, 0.0 }
 0xfcb   :  { %1392 = vadd.xlane.f32.xlu1 %v1391_v18  ;;  %v1753_v20 = vpop.f32.mrf.mxu0 }
 0xfcc   :  { %v1386_v28 = vadd.f32 %v1382_v27, %v1226_v59 }
 0xfce   :  { %v1394_v29 = vsel %vm104_vm1, %v1386_v28, 0.0 }
 0xfcf   :  { %1395 = vadd.xlane.f32.xlu0 %v1394_v29 }
0x1054   :  { %v1393_v31 = vpop.xlane.xlu1 %1392 }
0x1055   :  { %v1397_v33 = vmul.f32 0.03125, %v1393_v31 }
0x1057   :  { %v1399_v34 = vsub.f32 %v1385_v19, %v1397_v33 }
0x1058   :  { %v1396_v24 = vpop.xlane.xlu0 %1395 }
0x1059   :  { %v1398_v35 = vmul.f32 0.03125, %v1396_v24  ;;  %v1401_v25 = vmul.f32 %v1399_v34, %v1399_v34 }
0x105b   :  { %v1400_v37 = vsub.f32 %v1386_v28, %v1398_v35  ;;  %v1403_v38 = vsel %vm104_vm1, %v1401_v25, 0.0 }
0x105c   :  { %1404 = vadd.xlane.f32.xlu1 %v1403_v38 }
0x105d   :  { %v1402_v39 = vmul.f32 %v1400_v37, %v1400_v37 }
0x105f   :  { %v1406_v8 = vsel %vm104_vm1, %v1402_v39, 0.0 }
0x1060   :  { %1407 = vadd.xlane.f32.xlu0 %v1406_v8 }
0x10e5   :  { %v1405_v30 = vpop.xlane.xlu1 %1404 }
0x10e6   :  { %v1409_v11 = vmul.f32 0.03125, %v1405_v30 }
0x10e8   :  { %v1411_v36 = vadd.f32 1e-05, %v1409_v11 }
0x10e9   :  { %v1408_v13 = vpop.xlane.xlu0 %1407 }
0x10ea   :  { %1810 = vrsqrt.f32 %v1411_v36  ;;  %v1410_v40 = vmul.f32 0.03125, %v1408_v13 }
0x10ec   :  { %v1412_v10 = vadd.f32 1e-05, %v1410_v40 }
0x10ee   :  { %1812 = vrsqrt.f32 %v1412_v10 }
0x10f7   :  { %v1811_v41 = vpop.eup %1810 }
0x10f8   :  { %v1415_v15 = vmul.f32 %v1811_v41, %v1399_v34 }
0x10fa   :  { %v1423_v48 = vmul.f32 %v1528_v47, %v1415_v15 }
0x10fb   :  { %v1813_v42 = vpop.eup %1812 }
0x10fc   :  { %v1431_v16 = vadd.f32 %v1529_v14, %v1423_v48  ;;  %v1416_v17 = vmul.f32 %v1813_v42, %v1400_v37 }
0x10fe   :  { %1433 = vst.msk [vmem:[%s2385_s18] sm:$0xff] %vm104_vm1, %v1431_v16  ;;  %v1424_v43 = vmul.f32 %v1528_v47, %v1416_v17 }
0x1100   :  { %v1432_v44 = vadd.f32 %v1529_v14, %v1424_v43 }
0x1102   :  { %1434 = vst.msk [vmem:[%s2385_s18 + $0x8] sm:$0xff] %vm104_vm1, %v1432_v44 }

</bundles_post_ra>
